<compile_context>
chip_gen: v5e
topology: v5e:2x2
jax: 0.10.0
libtpu: 0.0.40
codegen_flags: <defaults>
</compile_context>

<pallas_src>
import functools
import math

import jax
import jax.numpy as jnp
from jax.experimental import pallas as pl
from jax.experimental.pallas import tpu as pltpu

_INV_SQRT2 = 1.0 / math.sqrt(2.0)
_CHUNK = 8            # sublane rows per register-resident inner chunk (= 1 f32 vreg)
_PAIR = 2 * _CHUNK    # rows per 2x-unrolled loop iteration
_MAX_TILE_M = 512     # sublane rows per grid block (512*128 samples, 2 MiB @ 8 planes)


def _choose_tile_m(num_vals):
    """Pick (tile_m, m_rows): multiples of 16 rows, blocks <= _MAX_TILE_M rows,
    >= 2 blocks when N is large enough (v7x megacore), minimal padding tail."""
    rows_needed = max(1, -(-num_vals // 128))
    rows = -(-rows_needed // _PAIR) * _PAIR
    min_blocks = 2 if rows >= 2 * _PAIR else 1
    num_blocks = max(min_blocks, -(-rows // _MAX_TILE_M))
    tile_m = -(-(-(-rows // num_blocks)) // _PAIR) * _PAIR
    tile_m = min(tile_m, _MAX_TILE_M)
    m_rows = -(-rows // tile_m) * tile_m
    return tile_m, m_rows


def _qsp_kernel(cos_ref, sin_ref, w_ref, out_ref, *, structured):
    """cos_ref/sin_ref: SMEM (num_phi,) f32 = cos(phi/2), sin(phi/2).
    w_ref: VMEM (planes, tile_m, 128) f32.
       structured=True : planes = (a, b) for W = [[a, i b],[i b, a]].
       structured=False: planes 0..3 = Re(W00,W01,W10,W11), 4..7 = Im(...).
    out_ref: VMEM (tile_m, 128) f32 = Re(U_qsp[0,0]) per sample."""
    tile_m = w_ref.shape[1]
    num_phi = cos_ref.shape[0]
    n_pairs = tile_m // _PAIR

    # Scalar phase table -> sregs (one SMEM read each per grid step).
    cs = [cos_ref[k] for k in range(num_phi)]
    ss = [sin_ref[k] for k in range(num_phi)]

    # Fold RZ(phi[0]) and both Hadamard 1/sqrt(2) factors into the (sample-
    # independent) initial state: t = 0.5 * RZ(phi0) @ (1, 1)^T.
    t0_re = jnp.full((_CHUNK, 128), 0.5 * cs[0], jnp.float32)
    t0_im = jnp.full((_CHUNK, 128), -0.5 * ss[0], jnp.float32)
    t1_re = t0_re
    t1_im = jnp.full((_CHUNK, 128), 0.5 * ss[0], jnp.float32)

    # Hoist all cos/sin splats above the chunk loop: materialized once per grid
    # step instead of once per chunk per phase (broadcast_in_dim is not CSE'd).
    cb = [jnp.full((_CHUNK, 128), cs[k], jnp.float32) for k in range(1, num_phi - 1)]
    sb = [jnp.full((_CHUNK, 128), ss[k], jnp.float32) for k in range(1, num_phi - 1)]
    c_last = jnp.full((_CHUNK, 128), cs[num_phi - 1], jnp.float32)
    s_last = jnp.full((_CHUNK, 128), ss[num_phi - 1], jnp.float32)

    def chunk_body(row):
        sl = pl.ds(row, _CHUNK)
        if structured:
            wa = w_ref[0, sl, :]          # a  (= W00 = W11, real)
            wb = w_ref[1, sl, :]          # b  (W01 = W10 = i*b)
            # k = 0: W applied to the folded initial state.
            v0_re = wa * t0_re - wb * t1_im
            v0_im = wa * t0_im + wb * t1_re
            v1_re = wa * t1_re - wb * t0_im
            v1_im = wa * t1_im + wb * t0_re
            # Phases 1..num_phi-2 (unrolled at trace time; degree is small).
            for k in range(num_phi - 2):
                ck = cb[k]; sk = sb[k]
                u0_re = ck * v0_re + sk * v0_im
                u0_im = ck * v0_im - sk * v0_re
                u1_re = ck * v1_re - sk * v1_im
                u1_im = ck * v1_im + sk * v1_re
                v0_re = wa * u0_re - wb * u1_im
                v0_im = wa * u0_im + wb * u1_re
                v1_re = wa * u1_re - wb * u0_im
                v1_im = wa * u1_im + wb * u0_re
        else:
            a_re = w_ref[0, sl, :]; b_re = w_ref[1, sl, :]
            c_re = w_ref[2, sl, :]; d_re = w_ref[3, sl, :]
            a_im = w_ref[4, sl, :]; b_im = w_ref[5, sl, :]
            c_im = w_ref[6, sl, :]; d_im = w_ref[7, sl, :]
            v0_re = a_re * t0_re - a_im * t0_im + b_re * t1_re - b_im * t1_im
            v0_im = a_re * t0_im + a_im * t0_re + b_re * t1_im + b_im * t1_re
            v1_re = c_re * t0_re - c_im * t0_im + d_re * t1_re - d_im * t1_im
            v1_im = c_re * t0_im + c_im * t0_re + d_re * t1_im + d_im * t1_re
            for k in range(num_phi - 2):
                ck = cb[k]; sk = sb[k]
                u0_re = ck * v0_re + sk * v0_im
                u0_im = ck * v0_im - sk * v0_re
                u1_re = ck * v1_re - sk * v1_im
                u1_im = ck * v1_im + sk * v1_re
                v0_re = a_re * u0_re - a_im * u0_im + b_re * u1_re - b_im * u1_im
                v0_im = a_re * u0_im + a_im * u0_re + b_re * u1_im + b_im * u1_re
                v1_re = c_re * u0_re - c_im * u0_im + d_re * u1_re - d_im * u1_im
                v1_im = c_re * u0_im + c_im * u0_re + d_re * u1_im + d_im * u1_re
        # Final RZ(phi[-1]) + Hadamard row 0; 1/sqrt(2) factors already folded.
        out_ref[sl, :] = (c_last * v0_re + s_last * v0_im) + \
                         (c_last * v1_re - s_last * v1_im)

    # Chunk loop, unrolled by 2: two independent (8,128) chunks per iteration
    # (doubles ILP on the 4 VALU slots; ~2x live vregs stays under 64).
    @pl.loop(0, n_pairs)
    def _(p):
        row = pl.multiple_of(p * _PAIR, _PAIR)
        chunk_body(row)
        chunk_body(row + _CHUNK)


def pack_omega(omega_mats):
    """General one-time layout transform: (N,2,2) complex64 ->
    ((8, m_rows, 128) f32, tile_m). Sample n lives at [:, n // 128, n % 128].
    omega is fixed across phi updates, so pack once and reuse."""
    num_vals = omega_mats.shape[0]
    tile_m, m_rows = _choose_tile_m(num_vals)
    n_pad = m_rows * 128
    flat = jnp.transpose(omega_mats.reshape(num_vals, 4))          # (4, N) complex
    planes = jnp.concatenate(
        [jnp.real(flat), jnp.imag(flat)], axis=0).astype(jnp.float32)  # (8, N)
    planes = jnp.pad(planes, ((0, 0), (0, n_pad - num_vals)))
    return planes.reshape(8, m_rows, 128), tile_m


def pack_omega_structured(omega_mats):
    """Fast-path packing, ONLY valid for the demo's signal operators
    W(a) = [[a, i b],[i b, a]], b = sqrt(1-a^2): packs just (a, b) ->
    ((2, m_rows, 128) f32, tile_m) -> 4x less HBM traffic, ~40% fewer VALU ops."""
    num_vals = omega_mats.shape[0]
    tile_m, m_rows = _choose_tile_m(num_vals)
    n_pad = m_rows * 128
    a = jnp.real(omega_mats[:, 0, 0]).astype(jnp.float32)
    b = jnp.imag(omega_mats[:, 0, 1]).astype(jnp.float32)
    planes = jnp.stack([a, b], axis=0)                             # (2, N)
    planes = jnp.pad(planes, ((0, 0), (0, n_pad - num_vals)))
    return planes.reshape(2, m_rows, 128), tile_m


def qsp_func_fit_forward(phi, omega_packed, num_vals, tile_m):
    """phi: (degree+1,) f32 with degree >= 1; (omega_packed, tile_m) from
    pack_omega / pack_omega_structured. Returns (num_vals,) f32 Re(U[0,0])."""
    num_planes, m_rows, _ = omega_packed.shape
    structured = (num_planes == 2)
    num_blocks = m_rows // tile_m
    num_phi = phi.shape[0]
    assert num_phi >= 2, "QSP_Func_Fit forward assumes degree >= 1 (num_phi >= 2)"

    phi_f32 = phi.astype(jnp.float32)
    cos_half = jnp.cos(0.5 * phi_f32)
    sin_half = jnp.sin(0.5 * phi_f32)

    # Default scoped VMEM suffices at tile_m <= 512; only raise the limit if a
    # tuned tile would exceed the smallest default (v5e: 16 MiB).
    block_bytes = (num_planes + 1) * tile_m * 128 * 4
    vmem_needed = 2 * block_bytes + (1 << 20)     # double-buffered + slack
    compiler_params = pltpu.CompilerParams(
        dimension_semantics=("parallel",),
        vmem_limit_bytes=vmem_needed if vmem_needed > (16 << 20) else None,
    )

    out = pl.pallas_call(
        functools.partial(_qsp_kernel, structured=structured),
        out_shape=jax.ShapeDtypeStruct((m_rows, 128), jnp.float32),
        grid=(num_blocks,),
        in_specs=[
            pl.BlockSpec(memory_space=pltpu.MemorySpace.SMEM),          # cos(phi/2)
            pl.BlockSpec(memory_space=pltpu.MemorySpace.SMEM),          # sin(phi/2)
            pl.BlockSpec((num_planes, tile_m, 128), lambda i: (0, i, 0)),
        ],
        out_specs=pl.BlockSpec((tile_m, 128), lambda i: (i, 0)),
        compiler_params=compiler_params,
    )(cos_half, sin_half, omega_packed)
    return out.reshape(m_rows * 128)[:num_vals]


def reference_forward(phi, omega_mats):
    """Pure-JAX complex reference of the PennyLane circuit matrix."""
    H = (1.0 / jnp.sqrt(2.0)).astype(jnp.complex64) * jnp.array(
        [[1.0, 1.0], [1.0, -1.0]], dtype=jnp.complex64)
    outs = []
    for i in range(omega_mats.shape[0]):
        W = omega_mats[i]
        U = H
        for k in range(phi.shape[0] - 1):
            rz = jnp.diag(jnp.stack(
                [jnp.exp(-0.5j * phi[k]), jnp.exp(0.5j * phi[k])]).astype(jnp.complex64))
            U = W @ (rz @ U)
        rz = jnp.diag(jnp.stack(
            [jnp.exp(-0.5j * phi[-1]), jnp.exp(0.5j * phi[-1])]).astype(jnp.complex64))
        U = H @ (rz @ U)
        outs.append(jnp.real(U[0, 0]).astype(jnp.float32))
    return jnp.stack(outs)


if __name__ == "__main__":
    degree = 9      # -> num_phi = 10 trainable phases (matches __init__)
    num_vals = 8    # number of sampled signal operators

    key = jax.random.PRNGKey(0)
    k_phi, _ = jax.random.split(key)
    # phi = pi * rand(degree + 1), deterministic init (mirrors torch init shape).
    phi = math.pi * jax.random.uniform(k_phi, (degree + 1,), dtype=jnp.float32)

    # Signal operators W(a) = [[a, i sqrt(1-a^2)], [i sqrt(1-a^2), a]] as in the demo.
    a = jnp.linspace(-1.0, 1.0, num_vals, dtype=jnp.float32)
    off = jnp.sqrt(jnp.clip(1.0 - a * a, 0.0, 1.0))
    a_c = a.astype(jnp.complex64)
    off_c = (1j * off).astype(jnp.complex64)
    omega_mats = jnp.stack(
        [jnp.stack([a_c, off_c], axis=-1),
         jnp.stack([off_c, a_c], axis=-1)],
        axis=-2)  # (num_vals, 2, 2) complex64

    y_ref = reference_forward(phi, omega_mats)

    # General 8-plane path (arbitrary 2x2 W).
    omega_packed, tile_m = pack_omega(omega_mats)
    y_gen = jax.block_until_ready(
        qsp_func_fit_forward(phi, omega_packed, num_vals, tile_m))
    assert y_gen.shape == (num_vals,) and y_gen.dtype == jnp.float32
    assert jnp.allclose(y_gen, y_ref, atol=1e-5), (y_gen, y_ref)

    # Structured 2-plane fast path (valid for the demo's W(a) form only).
    omega_packed_s, tile_m_s = pack_omega_structured(omega_mats)
    y_str = jax.block_until_ready(
        qsp_func_fit_forward(phi, omega_packed_s, num_vals, tile_m_s))
    assert y_str.shape == (num_vals,) and y_str.dtype == jnp.float32
    assert jnp.allclose(y_str, y_ref, atol=1e-5), (y_str, y_ref)

    print("KERNEL_OK")
</pallas_src>

<mosaic_0001>
module attributes {stable_mosaic.version = 11 : i64} {
  func.func @_qsp_kernel(%arg0: i32, %arg1: memref<10xf32, #tpu.memory_space<smem>>, %arg2: memref<10xf32, #tpu.memory_space<smem>>, %arg3: memref<8x16x128xf32, #tpu.memory_space<vmem>>, %arg4: memref<16x128xf32, #tpu.memory_space<vmem>>) attributes {dimension_semantics = [#tpu.dimension_semantics<parallel>], iteration_bounds = array<i64: 1>, scalar_prefetch = 0 : i64, scratch_operands = 0 : i64, tpu.core_type = #tpu.core_type<tc>, window_params = [{transform_indices = @transform_0, window_bounds = array<i64: 10>}, {transform_indices = @transform_1, window_bounds = array<i64: 10>}, {transform_indices = @transform_2, window_bounds = array<i64: 8, 16, 128>}, {transform_indices = @transform_3, window_bounds = array<i64: 16, 128>}]} {
    %c0 = arith.constant 0 : index
    %0 = memref.load %arg1[%c0] : memref<10xf32, #tpu.memory_space<smem>>
    %c1 = arith.constant 1 : index
    %1 = memref.load %arg1[%c1] : memref<10xf32, #tpu.memory_space<smem>>
    %c2 = arith.constant 2 : index
    %2 = memref.load %arg1[%c2] : memref<10xf32, #tpu.memory_space<smem>>
    %c3 = arith.constant 3 : index
    %3 = memref.load %arg1[%c3] : memref<10xf32, #tpu.memory_space<smem>>
    %c4 = arith.constant 4 : index
    %4 = memref.load %arg1[%c4] : memref<10xf32, #tpu.memory_space<smem>>
    %c5 = arith.constant 5 : index
    %5 = memref.load %arg1[%c5] : memref<10xf32, #tpu.memory_space<smem>>
    %c6 = arith.constant 6 : index
    %6 = memref.load %arg1[%c6] : memref<10xf32, #tpu.memory_space<smem>>
    %c7 = arith.constant 7 : index
    %7 = memref.load %arg1[%c7] : memref<10xf32, #tpu.memory_space<smem>>
    %c8 = arith.constant 8 : index
    %8 = memref.load %arg1[%c8] : memref<10xf32, #tpu.memory_space<smem>>
    %c9 = arith.constant 9 : index
    %9 = memref.load %arg1[%c9] : memref<10xf32, #tpu.memory_space<smem>>
    %c0_0 = arith.constant 0 : index
    %10 = memref.load %arg2[%c0_0] : memref<10xf32, #tpu.memory_space<smem>>
    %c1_1 = arith.constant 1 : index
    %11 = memref.load %arg2[%c1_1] : memref<10xf32, #tpu.memory_space<smem>>
    %c2_2 = arith.constant 2 : index
    %12 = memref.load %arg2[%c2_2] : memref<10xf32, #tpu.memory_space<smem>>
    %c3_3 = arith.constant 3 : index
    %13 = memref.load %arg2[%c3_3] : memref<10xf32, #tpu.memory_space<smem>>
    %c4_4 = arith.constant 4 : index
    %14 = memref.load %arg2[%c4_4] : memref<10xf32, #tpu.memory_space<smem>>
    %c5_5 = arith.constant 5 : index
    %15 = memref.load %arg2[%c5_5] : memref<10xf32, #tpu.memory_space<smem>>
    %c6_6 = arith.constant 6 : index
    %16 = memref.load %arg2[%c6_6] : memref<10xf32, #tpu.memory_space<smem>>
    %c7_7 = arith.constant 7 : index
    %17 = memref.load %arg2[%c7_7] : memref<10xf32, #tpu.memory_space<smem>>
    %c8_8 = arith.constant 8 : index
    %18 = memref.load %arg2[%c8_8] : memref<10xf32, #tpu.memory_space<smem>>
    %c9_9 = arith.constant 9 : index
    %19 = memref.load %arg2[%c9_9] : memref<10xf32, #tpu.memory_space<smem>>
    %cst = arith.constant 5.000000e-01 : f32
    %20 = arith.mulf %cst, %0 : f32
    %21 = vector.broadcast %20 : f32 to vector<8x128xf32>
    %cst_10 = arith.constant -5.000000e-01 : f32
    %22 = arith.mulf %cst_10, %10 : f32
    %23 = vector.broadcast %22 : f32 to vector<8x128xf32>
    %cst_11 = arith.constant 5.000000e-01 : f32
    %24 = arith.mulf %cst_11, %10 : f32
    %25 = vector.broadcast %24 : f32 to vector<8x128xf32>
    %26 = vector.broadcast %1 : f32 to vector<8x128xf32>
    %27 = vector.broadcast %2 : f32 to vector<8x128xf32>
    %28 = vector.broadcast %3 : f32 to vector<8x128xf32>
    %29 = vector.broadcast %4 : f32 to vector<8x128xf32>
    %30 = vector.broadcast %5 : f32 to vector<8x128xf32>
    %31 = vector.broadcast %6 : f32 to vector<8x128xf32>
    %32 = vector.broadcast %7 : f32 to vector<8x128xf32>
    %33 = vector.broadcast %8 : f32 to vector<8x128xf32>
    %34 = vector.broadcast %11 : f32 to vector<8x128xf32>
    %35 = vector.broadcast %12 : f32 to vector<8x128xf32>
    %36 = vector.broadcast %13 : f32 to vector<8x128xf32>
    %37 = vector.broadcast %14 : f32 to vector<8x128xf32>
    %38 = vector.broadcast %15 : f32 to vector<8x128xf32>
    %39 = vector.broadcast %16 : f32 to vector<8x128xf32>
    %40 = vector.broadcast %17 : f32 to vector<8x128xf32>
    %41 = vector.broadcast %18 : f32 to vector<8x128xf32>
    %42 = vector.broadcast %9 : f32 to vector<8x128xf32>
    %43 = vector.broadcast %19 : f32 to vector<8x128xf32>
    %c0_i32 = arith.constant 0 : i32
    %c1_i32 = arith.constant 1 : i32
    %44 = arith.muli %c0_i32, %c1_i32 : i32
    %c0_i32_12 = arith.constant 0 : i32
    %45 = arith.addi %c0_i32_12, %44 : i32
    %c16_i32 = arith.constant 16 : i32
    %46 = arith.muli %45, %c16_i32 : i32
    %47 = tpu.assume_multiple %46, 16 : i32
    %c0_13 = arith.constant 0 : index
    %48 = arith.index_cast %47 : i32 to index
    %c0_14 = arith.constant 0 : index
    %49 = vector.load %arg3[%c0_13, %48, %c0_14] : memref<8x16x128xf32, #tpu.memory_space<vmem>>, vector<1x8x128xf32>
    %50 = vector.shape_cast %49 : vector<1x8x128xf32> to vector<8x128xf32>
    %c1_15 = arith.constant 1 : index
    %51 = arith.index_cast %47 : i32 to index
    %c0_16 = arith.constant 0 : index
    %52 = vector.load %arg3[%c1_15, %51, %c0_16] : memref<8x16x128xf32, #tpu.memory_space<vmem>>, vector<1x8x128xf32>
    %53 = vector.shape_cast %52 : vector<1x8x128xf32> to vector<8x128xf32>
    %c2_17 = arith.constant 2 : index
    %54 = arith.index_cast %47 : i32 to index
    %c0_18 = arith.constant 0 : index
    %55 = vector.load %arg3[%c2_17, %54, %c0_18] : memref<8x16x128xf32, #tpu.memory_space<vmem>>, vector<1x8x128xf32>
    %56 = vector.shape_cast %55 : vector<1x8x128xf32> to vector<8x128xf32>
    %c3_19 = arith.constant 3 : index
    %57 = arith.index_cast %47 : i32 to index
    %c0_20 = arith.constant 0 : index
    %58 = vector.load %arg3[%c3_19, %57, %c0_20] : memref<8x16x128xf32, #tpu.memory_space<vmem>>, vector<1x8x128xf32>
    %59 = vector.shape_cast %58 : vector<1x8x128xf32> to vector<8x128xf32>
    %c4_21 = arith.constant 4 : index
    %60 = arith.index_cast %47 : i32 to index
    %c0_22 = arith.constant 0 : index
    %61 = vector.load %arg3[%c4_21, %60, %c0_22] : memref<8x16x128xf32, #tpu.memory_space<vmem>>, vector<1x8x128xf32>
    %62 = vector.shape_cast %61 : vector<1x8x128xf32> to vector<8x128xf32>
    %c5_23 = arith.constant 5 : index
    %63 = arith.index_cast %47 : i32 to index
    %c0_24 = arith.constant 0 : index
    %64 = vector.load %arg3[%c5_23, %63, %c0_24] : memref<8x16x128xf32, #tpu.memory_space<vmem>>, vector<1x8x128xf32>
    %65 = vector.shape_cast %64 : vector<1x8x128xf32> to vector<8x128xf32>
    %c6_25 = arith.constant 6 : index
    %66 = arith.index_cast %47 : i32 to index
    %c0_26 = arith.constant 0 : index
    %67 = vector.load %arg3[%c6_25, %66, %c0_26] : memref<8x16x128xf32, #tpu.memory_space<vmem>>, vector<1x8x128xf32>
    %68 = vector.shape_cast %67 : vector<1x8x128xf32> to vector<8x128xf32>
    %c7_27 = arith.constant 7 : index
    %69 = arith.index_cast %47 : i32 to index
    %c0_28 = arith.constant 0 : index
    %70 = vector.load %arg3[%c7_27, %69, %c0_28] : memref<8x16x128xf32, #tpu.memory_space<vmem>>, vector<1x8x128xf32>
    %71 = vector.shape_cast %70 : vector<1x8x128xf32> to vector<8x128xf32>
    %72 = arith.mulf %50, %21 : vector<8x128xf32>
    %73 = arith.mulf %62, %23 : vector<8x128xf32>
    %74 = arith.subf %72, %73 : vector<8x128xf32>
    %75 = arith.mulf %53, %21 : vector<8x128xf32>
    %76 = arith.addf %74, %75 : vector<8x128xf32>
    %77 = arith.mulf %65, %25 : vector<8x128xf32>
    %78 = arith.subf %76, %77 : vector<8x128xf32>
    %79 = arith.mulf %50, %23 : vector<8x128xf32>
    %80 = arith.mulf %62, %21 : vector<8x128xf32>
    %81 = arith.addf %79, %80 : vector<8x128xf32>
    %82 = arith.mulf %53, %25 : vector<8x128xf32>
    %83 = arith.addf %81, %82 : vector<8x128xf32>
    %84 = arith.mulf %65, %21 : vector<8x128xf32>
    %85 = arith.addf %83, %84 : vector<8x128xf32>
    %86 = arith.mulf %56, %21 : vector<8x128xf32>
    %87 = arith.mulf %68, %23 : vector<8x128xf32>
    %88 = arith.subf %86, %87 : vector<8x128xf32>
    %89 = arith.mulf %59, %21 : vector<8x128xf32>
    %90 = arith.addf %88, %89 : vector<8x128xf32>
    %91 = arith.mulf %71, %25 : vector<8x128xf32>
    %92 = arith.subf %90, %91 : vector<8x128xf32>
    %93 = arith.mulf %56, %23 : vector<8x128xf32>
    %94 = arith.mulf %68, %21 : vector<8x128xf32>
    %95 = arith.addf %93, %94 : vector<8x128xf32>
    %96 = arith.mulf %59, %25 : vector<8x128xf32>
    %97 = arith.addf %95, %96 : vector<8x128xf32>
    %98 = arith.mulf %71, %21 : vector<8x128xf32>
    %99 = arith.addf %97, %98 : vector<8x128xf32>
    %100 = arith.mulf %26, %78 : vector<8x128xf32>
    %101 = arith.mulf %34, %85 : vector<8x128xf32>
    %102 = arith.addf %100, %101 : vector<8x128xf32>
    %103 = arith.mulf %26, %85 : vector<8x128xf32>
    %104 = arith.mulf %34, %78 : vector<8x128xf32>
    %105 = arith.subf %103, %104 : vector<8x128xf32>
    %106 = arith.mulf %26, %92 : vector<8x128xf32>
    %107 = arith.mulf %34, %99 : vector<8x128xf32>
    %108 = arith.subf %106, %107 : vector<8x128xf32>
    %109 = arith.mulf %26, %99 : vector<8x128xf32>
    %110 = arith.mulf %34, %92 : vector<8x128xf32>
    %111 = arith.addf %109, %110 : vector<8x128xf32>
    %112 = arith.mulf %50, %102 : vector<8x128xf32>
    %113 = arith.mulf %62, %105 : vector<8x128xf32>
    %114 = arith.subf %112, %113 : vector<8x128xf32>
    %115 = arith.mulf %53, %108 : vector<8x128xf32>
    %116 = arith.addf %114, %115 : vector<8x128xf32>
    %117 = arith.mulf %65, %111 : vector<8x128xf32>
    %118 = arith.subf %116, %117 : vector<8x128xf32>
    %119 = arith.mulf %50, %105 : vector<8x128xf32>
    %120 = arith.mulf %62, %102 : vector<8x128xf32>
    %121 = arith.addf %119, %120 : vector<8x128xf32>
    %122 = arith.mulf %53, %111 : vector<8x128xf32>
    %123 = arith.addf %121, %122 : vector<8x128xf32>
    %124 = arith.mulf %65, %108 : vector<8x128xf32>
    %125 = arith.addf %123, %124 : vector<8x128xf32>
    %126 = arith.mulf %56, %102 : vector<8x128xf32>
    %127 = arith.mulf %68, %105 : vector<8x128xf32>
    %128 = arith.subf %126, %127 : vector<8x128xf32>
    %129 = arith.mulf %59, %108 : vector<8x128xf32>
    %130 = arith.addf %128, %129 : vector<8x128xf32>
    %131 = arith.mulf %71, %111 : vector<8x128xf32>
    %132 = arith.subf %130, %131 : vector<8x128xf32>
    %133 = arith.mulf %56, %105 : vector<8x128xf32>
    %134 = arith.mulf %68, %102 : vector<8x128xf32>
    %135 = arith.addf %133, %134 : vector<8x128xf32>
    %136 = arith.mulf %59, %111 : vector<8x128xf32>
    %137 = arith.addf %135, %136 : vector<8x128xf32>
    %138 = arith.mulf %71, %108 : vector<8x128xf32>
    %139 = arith.addf %137, %138 : vector<8x128xf32>
    %140 = arith.mulf %27, %118 : vector<8x128xf32>
    %141 = arith.mulf %35, %125 : vector<8x128xf32>
    %142 = arith.addf %140, %141 : vector<8x128xf32>
    %143 = arith.mulf %27, %125 : vector<8x128xf32>
    %144 = arith.mulf %35, %118 : vector<8x128xf32>
    %145 = arith.subf %143, %144 : vector<8x128xf32>
    %146 = arith.mulf %27, %132 : vector<8x128xf32>
    %147 = arith.mulf %35, %139 : vector<8x128xf32>
    %148 = arith.subf %146, %147 : vector<8x128xf32>
    %149 = arith.mulf %27, %139 : vector<8x128xf32>
    %150 = arith.mulf %35, %132 : vector<8x128xf32>
    %151 = arith.addf %149, %150 : vector<8x128xf32>
    %152 = arith.mulf %50, %142 : vector<8x128xf32>
    %153 = arith.mulf %62, %145 : vector<8x128xf32>
    %154 = arith.subf %152, %153 : vector<8x128xf32>
    %155 = arith.mulf %53, %148 : vector<8x128xf32>
    %156 = arith.addf %154, %155 : vector<8x128xf32>
    %157 = arith.mulf %65, %151 : vector<8x128xf32>
    %158 = arith.subf %156, %157 : vector<8x128xf32>
    %159 = arith.mulf %50, %145 : vector<8x128xf32>
    %160 = arith.mulf %62, %142 : vector<8x128xf32>
    %161 = arith.addf %159, %160 : vector<8x128xf32>
    %162 = arith.mulf %53, %151 : vector<8x128xf32>
    %163 = arith.addf %161, %162 : vector<8x128xf32>
    %164 = arith.mulf %65, %148 : vector<8x128xf32>
    %165 = arith.addf %163, %164 : vector<8x128xf32>
    %166 = arith.mulf %56, %142 : vector<8x128xf32>
    %167 = arith.mulf %68, %145 : vector<8x128xf32>
    %168 = arith.subf %166, %167 : vector<8x128xf32>
    %169 = arith.mulf %59, %148 : vector<8x128xf32>
    %170 = arith.addf %168, %169 : vector<8x128xf32>
    %171 = arith.mulf %71, %151 : vector<8x128xf32>
    %172 = arith.subf %170, %171 : vector<8x128xf32>
    %173 = arith.mulf %56, %145 : vector<8x128xf32>
    %174 = arith.mulf %68, %142 : vector<8x128xf32>
    %175 = arith.addf %173, %174 : vector<8x128xf32>
    %176 = arith.mulf %59, %151 : vector<8x128xf32>
    %177 = arith.addf %175, %176 : vector<8x128xf32>
    %178 = arith.mulf %71, %148 : vector<8x128xf32>
    %179 = arith.addf %177, %178 : vector<8x128xf32>
    %180 = arith.mulf %28, %158 : vector<8x128xf32>
    %181 = arith.mulf %36, %165 : vector<8x128xf32>
    %182 = arith.addf %180, %181 : vector<8x128xf32>
    %183 = arith.mulf %28, %165 : vector<8x128xf32>
    %184 = arith.mulf %36, %158 : vector<8x128xf32>
    %185 = arith.subf %183, %184 : vector<8x128xf32>
    %186 = arith.mulf %28, %172 : vector<8x128xf32>
    %187 = arith.mulf %36, %179 : vector<8x128xf32>
    %188 = arith.subf %186, %187 : vector<8x128xf32>
    %189 = arith.mulf %28, %179 : vector<8x128xf32>
    %190 = arith.mulf %36, %172 : vector<8x128xf32>
    %191 = arith.addf %189, %190 : vector<8x128xf32>
    %192 = arith.mulf %50, %182 : vector<8x128xf32>
    %193 = arith.mulf %62, %185 : vector<8x128xf32>
    %194 = arith.subf %192, %193 : vector<8x128xf32>
    %195 = arith.mulf %53, %188 : vector<8x128xf32>
    %196 = arith.addf %194, %195 : vector<8x128xf32>
    %197 = arith.mulf %65, %191 : vector<8x128xf32>
    %198 = arith.subf %196, %197 : vector<8x128xf32>
    %199 = arith.mulf %50, %185 : vector<8x128xf32>
    %200 = arith.mulf %62, %182 : vector<8x128xf32>
    %201 = arith.addf %199, %200 : vector<8x128xf32>
    %202 = arith.mulf %53, %191 : vector<8x128xf32>
    %203 = arith.addf %201, %202 : vector<8x128xf32>
    %204 = arith.mulf %65, %188 : vector<8x128xf32>
    %205 = arith.addf %203, %204 : vector<8x128xf32>
    %206 = arith.mulf %56, %182 : vector<8x128xf32>
    %207 = arith.mulf %68, %185 : vector<8x128xf32>
    %208 = arith.subf %206, %207 : vector<8x128xf32>
    %209 = arith.mulf %59, %188 : vector<8x128xf32>
    %210 = arith.addf %208, %209 : vector<8x128xf32>
    %211 = arith.mulf %71, %191 : vector<8x128xf32>
    %212 = arith.subf %210, %211 : vector<8x128xf32>
    %213 = arith.mulf %56, %185 : vector<8x128xf32>
    %214 = arith.mulf %68, %182 : vector<8x128xf32>
    %215 = arith.addf %213, %214 : vector<8x128xf32>
    %216 = arith.mulf %59, %191 : vector<8x128xf32>
    %217 = arith.addf %215, %216 : vector<8x128xf32>
    %218 = arith.mulf %71, %188 : vector<8x128xf32>
    %219 = arith.addf %217, %218 : vector<8x128xf32>
    %220 = arith.mulf %29, %198 : vector<8x128xf32>
    %221 = arith.mulf %37, %205 : vector<8x128xf32>
    %222 = arith.addf %220, %221 : vector<8x128xf32>
    %223 = arith.mulf %29, %205 : vector<8x128xf32>
    %224 = arith.mulf %37, %198 : vector<8x128xf32>
    %225 = arith.subf %223, %224 : vector<8x128xf32>
    %226 = arith.mulf %29, %212 : vector<8x128xf32>
    %227 = arith.mulf %37, %219 : vector<8x128xf32>
    %228 = arith.subf %226, %227 : vector<8x128xf32>
    %229 = arith.mulf %29, %219 : vector<8x128xf32>
    %230 = arith.mulf %37, %212 : vector<8x128xf32>
    %231 = arith.addf %229, %230 : vector<8x128xf32>
    %232 = arith.mulf %50, %222 : vector<8x128xf32>
    %233 = arith.mulf %62, %225 : vector<8x128xf32>
    %234 = arith.subf %232, %233 : vector<8x128xf32>
    %235 = arith.mulf %53, %228 : vector<8x128xf32>
    %236 = arith.addf %234, %235 : vector<8x128xf32>
    %237 = arith.mulf %65, %231 : vector<8x128xf32>
    %238 = arith.subf %236, %237 : vector<8x128xf32>
    %239 = arith.mulf %50, %225 : vector<8x128xf32>
    %240 = arith.mulf %62, %222 : vector<8x128xf32>
    %241 = arith.addf %239, %240 : vector<8x128xf32>
    %242 = arith.mulf %53, %231 : vector<8x128xf32>
    %243 = arith.addf %241, %242 : vector<8x128xf32>
    %244 = arith.mulf %65, %228 : vector<8x128xf32>
    %245 = arith.addf %243, %244 : vector<8x128xf32>
    %246 = arith.mulf %56, %222 : vector<8x128xf32>
    %247 = arith.mulf %68, %225 : vector<8x128xf32>
    %248 = arith.subf %246, %247 : vector<8x128xf32>
    %249 = arith.mulf %59, %228 : vector<8x128xf32>
    %250 = arith.addf %248, %249 : vector<8x128xf32>
    %251 = arith.mulf %71, %231 : vector<8x128xf32>
    %252 = arith.subf %250, %251 : vector<8x128xf32>
    %253 = arith.mulf %56, %225 : vector<8x128xf32>
    %254 = arith.mulf %68, %222 : vector<8x128xf32>
    %255 = arith.addf %253, %254 : vector<8x128xf32>
    %256 = arith.mulf %59, %231 : vector<8x128xf32>
    %257 = arith.addf %255, %256 : vector<8x128xf32>
    %258 = arith.mulf %71, %228 : vector<8x128xf32>
    %259 = arith.addf %257, %258 : vector<8x128xf32>
    %260 = arith.mulf %30, %238 : vector<8x128xf32>
    %261 = arith.mulf %38, %245 : vector<8x128xf32>
    %262 = arith.addf %260, %261 : vector<8x128xf32>
    %263 = arith.mulf %30, %245 : vector<8x128xf32>
    %264 = arith.mulf %38, %238 : vector<8x128xf32>
    %265 = arith.subf %263, %264 : vector<8x128xf32>
    %266 = arith.mulf %30, %252 : vector<8x128xf32>
    %267 = arith.mulf %38, %259 : vector<8x128xf32>
    %268 = arith.subf %266, %267 : vector<8x128xf32>
    %269 = arith.mulf %30, %259 : vector<8x128xf32>
    %270 = arith.mulf %38, %252 : vector<8x128xf32>
    %271 = arith.addf %269, %270 : vector<8x128xf32>
    %272 = arith.mulf %50, %262 : vector<8x128xf32>
    %273 = arith.mulf %62, %265 : vector<8x128xf32>
    %274 = arith.subf %272, %273 : vector<8x128xf32>
    %275 = arith.mulf %53, %268 : vector<8x128xf32>
    %276 = arith.addf %274, %275 : vector<8x128xf32>
    %277 = arith.mulf %65, %271 : vector<8x128xf32>
    %278 = arith.subf %276, %277 : vector<8x128xf32>
    %279 = arith.mulf %50, %265 : vector<8x128xf32>
    %280 = arith.mulf %62, %262 : vector<8x128xf32>
    %281 = arith.addf %279, %280 : vector<8x128xf32>
    %282 = arith.mulf %53, %271 : vector<8x128xf32>
    %283 = arith.addf %281, %282 : vector<8x128xf32>
    %284 = arith.mulf %65, %268 : vector<8x128xf32>
    %285 = arith.addf %283, %284 : vector<8x128xf32>
    %286 = arith.mulf %56, %262 : vector<8x128xf32>
    %287 = arith.mulf %68, %265 : vector<8x128xf32>
    %288 = arith.subf %286, %287 : vector<8x128xf32>
    %289 = arith.mulf %59, %268 : vector<8x128xf32>
    %290 = arith.addf %288, %289 : vector<8x128xf32>
    %291 = arith.mulf %71, %271 : vector<8x128xf32>
    %292 = arith.subf %290, %291 : vector<8x128xf32>
    %293 = arith.mulf %56, %265 : vector<8x128xf32>
    %294 = arith.mulf %68, %262 : vector<8x128xf32>
    %295 = arith.addf %293, %294 : vector<8x128xf32>
    %296 = arith.mulf %59, %271 : vector<8x128xf32>
    %297 = arith.addf %295, %296 : vector<8x128xf32>
    %298 = arith.mulf %71, %268 : vector<8x128xf32>
    %299 = arith.addf %297, %298 : vector<8x128xf32>
    %300 = arith.mulf %31, %278 : vector<8x128xf32>
    %301 = arith.mulf %39, %285 : vector<8x128xf32>
    %302 = arith.addf %300, %301 : vector<8x128xf32>
    %303 = arith.mulf %31, %285 : vector<8x128xf32>
    %304 = arith.mulf %39, %278 : vector<8x128xf32>
    %305 = arith.subf %303, %304 : vector<8x128xf32>
    %306 = arith.mulf %31, %292 : vector<8x128xf32>
    %307 = arith.mulf %39, %299 : vector<8x128xf32>
    %308 = arith.subf %306, %307 : vector<8x128xf32>
    %309 = arith.mulf %31, %299 : vector<8x128xf32>
    %310 = arith.mulf %39, %292 : vector<8x128xf32>
    %311 = arith.addf %309, %310 : vector<8x128xf32>
    %312 = arith.mulf %50, %302 : vector<8x128xf32>
    %313 = arith.mulf %62, %305 : vector<8x128xf32>
    %314 = arith.subf %312, %313 : vector<8x128xf32>
    %315 = arith.mulf %53, %308 : vector<8x128xf32>
    %316 = arith.addf %314, %315 : vector<8x128xf32>
    %317 = arith.mulf %65, %311 : vector<8x128xf32>
    %318 = arith.subf %316, %317 : vector<8x128xf32>
    %319 = arith.mulf %50, %305 : vector<8x128xf32>
    %320 = arith.mulf %62, %302 : vector<8x128xf32>
    %321 = arith.addf %319, %320 : vector<8x128xf32>
    %322 = arith.mulf %53, %311 : vector<8x128xf32>
    %323 = arith.addf %321, %322 : vector<8x128xf32>
    %324 = arith.mulf %65, %308 : vector<8x128xf32>
    %325 = arith.addf %323, %324 : vector<8x128xf32>
    %326 = arith.mulf %56, %302 : vector<8x128xf32>
    %327 = arith.mulf %68, %305 : vector<8x128xf32>
    %328 = arith.subf %326, %327 : vector<8x128xf32>
    %329 = arith.mulf %59, %308 : vector<8x128xf32>
    %330 = arith.addf %328, %329 : vector<8x128xf32>
    %331 = arith.mulf %71, %311 : vector<8x128xf32>
    %332 = arith.subf %330, %331 : vector<8x128xf32>
    %333 = arith.mulf %56, %305 : vector<8x128xf32>
    %334 = arith.mulf %68, %302 : vector<8x128xf32>
    %335 = arith.addf %333, %334 : vector<8x128xf32>
    %336 = arith.mulf %59, %311 : vector<8x128xf32>
    %337 = arith.addf %335, %336 : vector<8x128xf32>
    %338 = arith.mulf %71, %308 : vector<8x128xf32>
    %339 = arith.addf %337, %338 : vector<8x128xf32>
    %340 = arith.mulf %32, %318 : vector<8x128xf32>
    %341 = arith.mulf %40, %325 : vector<8x128xf32>
    %342 = arith.addf %340, %341 : vector<8x128xf32>
    %343 = arith.mulf %32, %325 : vector<8x128xf32>
    %344 = arith.mulf %40, %318 : vector<8x128xf32>
    %345 = arith.subf %343, %344 : vector<8x128xf32>
    %346 = arith.mulf %32, %332 : vector<8x128xf32>
    %347 = arith.mulf %40, %339 : vector<8x128xf32>
    %348 = arith.subf %346, %347 : vector<8x128xf32>
    %349 = arith.mulf %32, %339 : vector<8x128xf32>
    %350 = arith.mulf %40, %332 : vector<8x128xf32>
    %351 = arith.addf %349, %350 : vector<8x128xf32>
    %352 = arith.mulf %50, %342 : vector<8x128xf32>
    %353 = arith.mulf %62, %345 : vector<8x128xf32>
    %354 = arith.subf %352, %353 : vector<8x128xf32>
    %355 = arith.mulf %53, %348 : vector<8x128xf32>
    %356 = arith.addf %354, %355 : vector<8x128xf32>
    %357 = arith.mulf %65, %351 : vector<8x128xf32>
    %358 = arith.subf %356, %357 : vector<8x128xf32>
    %359 = arith.mulf %50, %345 : vector<8x128xf32>
    %360 = arith.mulf %62, %342 : vector<8x128xf32>
    %361 = arith.addf %359, %360 : vector<8x128xf32>
    %362 = arith.mulf %53, %351 : vector<8x128xf32>
    %363 = arith.addf %361, %362 : vector<8x128xf32>
    %364 = arith.mulf %65, %348 : vector<8x128xf32>
    %365 = arith.addf %363, %364 : vector<8x128xf32>
    %366 = arith.mulf %56, %342 : vector<8x128xf32>
    %367 = arith.mulf %68, %345 : vector<8x128xf32>
    %368 = arith.subf %366, %367 : vector<8x128xf32>
    %369 = arith.mulf %59, %348 : vector<8x128xf32>
    %370 = arith.addf %368, %369 : vector<8x128xf32>
    %371 = arith.mulf %71, %351 : vector<8x128xf32>
    %372 = arith.subf %370, %371 : vector<8x128xf32>
    %373 = arith.mulf %56, %345 : vector<8x128xf32>
    %374 = arith.mulf %68, %342 : vector<8x128xf32>
    %375 = arith.addf %373, %374 : vector<8x128xf32>
    %376 = arith.mulf %59, %351 : vector<8x128xf32>
    %377 = arith.addf %375, %376 : vector<8x128xf32>
    %378 = arith.mulf %71, %348 : vector<8x128xf32>
    %379 = arith.addf %377, %378 : vector<8x128xf32>
    %380 = arith.mulf %33, %358 : vector<8x128xf32>
    %381 = arith.mulf %41, %365 : vector<8x128xf32>
    %382 = arith.addf %380, %381 : vector<8x128xf32>
    %383 = arith.mulf %33, %365 : vector<8x128xf32>
    %384 = arith.mulf %41, %358 : vector<8x128xf32>
    %385 = arith.subf %383, %384 : vector<8x128xf32>
    %386 = arith.mulf %33, %372 : vector<8x128xf32>
    %387 = arith.mulf %41, %379 : vector<8x128xf32>
    %388 = arith.subf %386, %387 : vector<8x128xf32>
    %389 = arith.mulf %33, %379 : vector<8x128xf32>
    %390 = arith.mulf %41, %372 : vector<8x128xf32>
    %391 = arith.addf %389, %390 : vector<8x128xf32>
    %392 = arith.mulf %50, %382 : vector<8x128xf32>
    %393 = arith.mulf %62, %385 : vector<8x128xf32>
    %394 = arith.subf %392, %393 : vector<8x128xf32>
    %395 = arith.mulf %53, %388 : vector<8x128xf32>
    %396 = arith.addf %394, %395 : vector<8x128xf32>
    %397 = arith.mulf %65, %391 : vector<8x128xf32>
    %398 = arith.subf %396, %397 : vector<8x128xf32>
    %399 = arith.mulf %50, %385 : vector<8x128xf32>
    %400 = arith.mulf %62, %382 : vector<8x128xf32>
    %401 = arith.addf %399, %400 : vector<8x128xf32>
    %402 = arith.mulf %53, %391 : vector<8x128xf32>
    %403 = arith.addf %401, %402 : vector<8x128xf32>
    %404 = arith.mulf %65, %388 : vector<8x128xf32>
    %405 = arith.addf %403, %404 : vector<8x128xf32>
    %406 = arith.mulf %56, %382 : vector<8x128xf32>
    %407 = arith.mulf %68, %385 : vector<8x128xf32>
    %408 = arith.subf %406, %407 : vector<8x128xf32>
    %409 = arith.mulf %59, %388 : vector<8x128xf32>
    %410 = arith.addf %408, %409 : vector<8x128xf32>
    %411 = arith.mulf %71, %391 : vector<8x128xf32>
    %412 = arith.subf %410, %411 : vector<8x128xf32>
    %413 = arith.mulf %56, %385 : vector<8x128xf32>
    %414 = arith.mulf %68, %382 : vector<8x128xf32>
    %415 = arith.addf %413, %414 : vector<8x128xf32>
    %416 = arith.mulf %59, %391 : vector<8x128xf32>
    %417 = arith.addf %415, %416 : vector<8x128xf32>
    %418 = arith.mulf %71, %388 : vector<8x128xf32>
    %419 = arith.addf %417, %418 : vector<8x128xf32>
    %420 = arith.mulf %42, %398 : vector<8x128xf32>
    %421 = arith.mulf %43, %405 : vector<8x128xf32>
    %422 = arith.addf %420, %421 : vector<8x128xf32>
    %423 = arith.mulf %42, %412 : vector<8x128xf32>
    %424 = arith.mulf %43, %419 : vector<8x128xf32>
    %425 = arith.subf %423, %424 : vector<8x128xf32>
    %426 = arith.addf %422, %425 : vector<8x128xf32>
    %427 = arith.index_cast %47 : i32 to index
    %c0_29 = arith.constant 0 : index
    %428 = vector.load %arg4[%427, %c0_29] : memref<16x128xf32, #tpu.memory_space<vmem>>, vector<8x128xf32>
    tpu.vector_store %arg4[%427, %c0_29], %426 {strides = array<i32>} : memref<16x128xf32, #tpu.memory_space<vmem>>, vector<8x128xf32>,
    %c8_i32 = arith.constant 8 : i32
    %429 = arith.addi %47, %c8_i32 : i32
    %c0_30 = arith.constant 0 : index
    %430 = arith.index_cast %429 : i32 to index
    %c0_31 = arith.constant 0 : index
    %431 = vector.load %arg3[%c0_30, %430, %c0_31] : memref<8x16x128xf32, #tpu.memory_space<vmem>>, vector<1x8x128xf32>
    %432 = vector.shape_cast %431 : vector<1x8x128xf32> to vector<8x128xf32>
    %c1_32 = arith.constant 1 : index
    %433 = arith.index_cast %429 : i32 to index
    %c0_33 = arith.constant 0 : index
    %434 = vector.load %arg3[%c1_32, %433, %c0_33] : memref<8x16x128xf32, #tpu.memory_space<vmem>>, vector<1x8x128xf32>
    %435 = vector.shape_cast %434 : vector<1x8x128xf32> to vector<8x128xf32>
    %c2_34 = arith.constant 2 : index
    %436 = arith.index_cast %429 : i32 to index
    %c0_35 = arith.constant 0 : index
    %437 = vector.load %arg3[%c2_34, %436, %c0_35] : memref<8x16x128xf32, #tpu.memory_space<vmem>>, vector<1x8x128xf32>
    %438 = vector.shape_cast %437 : vector<1x8x128xf32> to vector<8x128xf32>
    %c3_36 = arith.constant 3 : index
    %439 = arith.index_cast %429 : i32 to index
    %c0_37 = arith.constant 0 : index
    %440 = vector.load %arg3[%c3_36, %439, %c0_37] : memref<8x16x128xf32, #tpu.memory_space<vmem>>, vector<1x8x128xf32>
    %441 = vector.shape_cast %440 : vector<1x8x128xf32> to vector<8x128xf32>
    %c4_38 = arith.constant 4 : index
    %442 = arith.index_cast %429 : i32 to index
    %c0_39 = arith.constant 0 : index
    %443 = vector.load %arg3[%c4_38, %442, %c0_39] : memref<8x16x128xf32, #tpu.memory_space<vmem>>, vector<1x8x128xf32>
    %444 = vector.shape_cast %443 : vector<1x8x128xf32> to vector<8x128xf32>
    %c5_40 = arith.constant 5 : index
    %445 = arith.index_cast %429 : i32 to index
    %c0_41 = arith.constant 0 : index
    %446 = vector.load %arg3[%c5_40, %445, %c0_41] : memref<8x16x128xf32, #tpu.memory_space<vmem>>, vector<1x8x128xf32>
    %447 = vector.shape_cast %446 : vector<1x8x128xf32> to vector<8x128xf32>
    %c6_42 = arith.constant 6 : index
    %448 = arith.index_cast %429 : i32 to index
    %c0_43 = arith.constant 0 : index
    %449 = vector.load %arg3[%c6_42, %448, %c0_43] : memref<8x16x128xf32, #tpu.memory_space<vmem>>, vector<1x8x128xf32>
    %450 = vector.shape_cast %449 : vector<1x8x128xf32> to vector<8x128xf32>
    %c7_44 = arith.constant 7 : index
    %451 = arith.index_cast %429 : i32 to index
    %c0_45 = arith.constant 0 : index
    %452 = vector.load %arg3[%c7_44, %451, %c0_45] : memref<8x16x128xf32, #tpu.memory_space<vmem>>, vector<1x8x128xf32>
    %453 = vector.shape_cast %452 : vector<1x8x128xf32> to vector<8x128xf32>
    %454 = arith.mulf %432, %21 : vector<8x128xf32>
    %455 = arith.mulf %444, %23 : vector<8x128xf32>
    %456 = arith.subf %454, %455 : vector<8x128xf32>
    %457 = arith.mulf %435, %21 : vector<8x128xf32>
    %458 = arith.addf %456, %457 : vector<8x128xf32>
    %459 = arith.mulf %447, %25 : vector<8x128xf32>
    %460 = arith.subf %458, %459 : vector<8x128xf32>
    %461 = arith.mulf %432, %23 : vector<8x128xf32>
    %462 = arith.mulf %444, %21 : vector<8x128xf32>
    %463 = arith.addf %461, %462 : vector<8x128xf32>
    %464 = arith.mulf %435, %25 : vector<8x128xf32>
    %465 = arith.addf %463, %464 : vector<8x128xf32>
    %466 = arith.mulf %447, %21 : vector<8x128xf32>
    %467 = arith.addf %465, %466 : vector<8x128xf32>
    %468 = arith.mulf %438, %21 : vector<8x128xf32>
    %469 = arith.mulf %450, %23 : vector<8x128xf32>
    %470 = arith.subf %468, %469 : vector<8x128xf32>
    %471 = arith.mulf %441, %21 : vector<8x128xf32>
    %472 = arith.addf %470, %471 : vector<8x128xf32>
    %473 = arith.mulf %453, %25 : vector<8x128xf32>
    %474 = arith.subf %472, %473 : vector<8x128xf32>
    %475 = arith.mulf %438, %23 : vector<8x128xf32>
    %476 = arith.mulf %450, %21 : vector<8x128xf32>
    %477 = arith.addf %475, %476 : vector<8x128xf32>
    %478 = arith.mulf %441, %25 : vector<8x128xf32>
    %479 = arith.addf %477, %478 : vector<8x128xf32>
    %480 = arith.mulf %453, %21 : vector<8x128xf32>
    %481 = arith.addf %479, %480 : vector<8x128xf32>
    %482 = arith.mulf %26, %460 : vector<8x128xf32>
    %483 = arith.mulf %34, %467 : vector<8x128xf32>
    %484 = arith.addf %482, %483 : vector<8x128xf32>
    %485 = arith.mulf %26, %467 : vector<8x128xf32>
    %486 = arith.mulf %34, %460 : vector<8x128xf32>
    %487 = arith.subf %485, %486 : vector<8x128xf32>
    %488 = arith.mulf %26, %474 : vector<8x128xf32>
    %489 = arith.mulf %34, %481 : vector<8x128xf32>
    %490 = arith.subf %488, %489 : vector<8x128xf32>
    %491 = arith.mulf %26, %481 : vector<8x128xf32>
    %492 = arith.mulf %34, %474 : vector<8x128xf32>
    %493 = arith.addf %491, %492 : vector<8x128xf32>
    %494 = arith.mulf %432, %484 : vector<8x128xf32>
    %495 = arith.mulf %444, %487 : vector<8x128xf32>
    %496 = arith.subf %494, %495 : vector<8x128xf32>
    %497 = arith.mulf %435, %490 : vector<8x128xf32>
    %498 = arith.addf %496, %497 : vector<8x128xf32>
    %499 = arith.mulf %447, %493 : vector<8x128xf32>
    %500 = arith.subf %498, %499 : vector<8x128xf32>
    %501 = arith.mulf %432, %487 : vector<8x128xf32>
    %502 = arith.mulf %444, %484 : vector<8x128xf32>
    %503 = arith.addf %501, %502 : vector<8x128xf32>
    %504 = arith.mulf %435, %493 : vector<8x128xf32>
    %505 = arith.addf %503, %504 : vector<8x128xf32>
    %506 = arith.mulf %447, %490 : vector<8x128xf32>
    %507 = arith.addf %505, %506 : vector<8x128xf32>
    %508 = arith.mulf %438, %484 : vector<8x128xf32>
    %509 = arith.mulf %450, %487 : vector<8x128xf32>
    %510 = arith.subf %508, %509 : vector<8x128xf32>
    %511 = arith.mulf %441, %490 : vector<8x128xf32>
    %512 = arith.addf %510, %511 : vector<8x128xf32>
    %513 = arith.mulf %453, %493 : vector<8x128xf32>
    %514 = arith.subf %512, %513 : vector<8x128xf32>
    %515 = arith.mulf %438, %487 : vector<8x128xf32>
    %516 = arith.mulf %450, %484 : vector<8x128xf32>
    %517 = arith.addf %515, %516 : vector<8x128xf32>
    %518 = arith.mulf %441, %493 : vector<8x128xf32>
    %519 = arith.addf %517, %518 : vector<8x128xf32>
    %520 = arith.mulf %453, %490 : vector<8x128xf32>
    %521 = arith.addf %519, %520 : vector<8x128xf32>
    %522 = arith.mulf %27, %500 : vector<8x128xf32>
    %523 = arith.mulf %35, %507 : vector<8x128xf32>
    %524 = arith.addf %522, %523 : vector<8x128xf32>
    %525 = arith.mulf %27, %507 : vector<8x128xf32>
    %526 = arith.mulf %35, %500 : vector<8x128xf32>
    %527 = arith.subf %525, %526 : vector<8x128xf32>
    %528 = arith.mulf %27, %514 : vector<8x128xf32>
    %529 = arith.mulf %35, %521 : vector<8x128xf32>
    %530 = arith.subf %528, %529 : vector<8x128xf32>
    %531 = arith.mulf %27, %521 : vector<8x128xf32>
    %532 = arith.mulf %35, %514 : vector<8x128xf32>
    %533 = arith.addf %531, %532 : vector<8x128xf32>
    %534 = arith.mulf %432, %524 : vector<8x128xf32>
    %535 = arith.mulf %444, %527 : vector<8x128xf32>
    %536 = arith.subf %534, %535 : vector<8x128xf32>
    %537 = arith.mulf %435, %530 : vector<8x128xf32>
    %538 = arith.addf %536, %537 : vector<8x128xf32>
    %539 = arith.mulf %447, %533 : vector<8x128xf32>
    %540 = arith.subf %538, %539 : vector<8x128xf32>
    %541 = arith.mulf %432, %527 : vector<8x128xf32>
    %542 = arith.mulf %444, %524 : vector<8x128xf32>
    %543 = arith.addf %541, %542 : vector<8x128xf32>
    %544 = arith.mulf %435, %533 : vector<8x128xf32>
    %545 = arith.addf %543, %544 : vector<8x128xf32>
    %546 = arith.mulf %447, %530 : vector<8x128xf32>
    %547 = arith.addf %545, %546 : vector<8x128xf32>
    %548 = arith.mulf %438, %524 : vector<8x128xf32>
    %549 = arith.mulf %450, %527 : vector<8x128xf32>
    %550 = arith.subf %548, %549 : vector<8x128xf32>
    %551 = arith.mulf %441, %530 : vector<8x128xf32>
    %552 = arith.addf %550, %551 : vector<8x128xf32>
    %553 = arith.mulf %453, %533 : vector<8x128xf32>
    %554 = arith.subf %552, %553 : vector<8x128xf32>
    %555 = arith.mulf %438, %527 : vector<8x128xf32>
    %556 = arith.mulf %450, %524 : vector<8x128xf32>
    %557 = arith.addf %555, %556 : vector<8x128xf32>
    %558 = arith.mulf %441, %533 : vector<8x128xf32>
    %559 = arith.addf %557, %558 : vector<8x128xf32>
    %560 = arith.mulf %453, %530 : vector<8x128xf32>
    %561 = arith.addf %559, %560 : vector<8x128xf32>
    %562 = arith.mulf %28, %540 : vector<8x128xf32>
    %563 = arith.mulf %36, %547 : vector<8x128xf32>
    %564 = arith.addf %562, %563 : vector<8x128xf32>
    %565 = arith.mulf %28, %547 : vector<8x128xf32>
    %566 = arith.mulf %36, %540 : vector<8x128xf32>
    %567 = arith.subf %565, %566 : vector<8x128xf32>
    %568 = arith.mulf %28, %554 : vector<8x128xf32>
    %569 = arith.mulf %36, %561 : vector<8x128xf32>
    %570 = arith.subf %568, %569 : vector<8x128xf32>
    %571 = arith.mulf %28, %561 : vector<8x128xf32>
    %572 = arith.mulf %36, %554 : vector<8x128xf32>
    %573 = arith.addf %571, %572 : vector<8x128xf32>
    %574 = arith.mulf %432, %564 : vector<8x128xf32>
    %575 = arith.mulf %444, %567 : vector<8x128xf32>
    %576 = arith.subf %574, %575 : vector<8x128xf32>
    %577 = arith.mulf %435, %570 : vector<8x128xf32>
    %578 = arith.addf %576, %577 : vector<8x128xf32>
    %579 = arith.mulf %447, %573 : vector<8x128xf32>
    %580 = arith.subf %578, %579 : vector<8x128xf32>
    %581 = arith.mulf %432, %567 : vector<8x128xf32>
    %582 = arith.mulf %444, %564 : vector<8x128xf32>
    %583 = arith.addf %581, %582 : vector<8x128xf32>
    %584 = arith.mulf %435, %573 : vector<8x128xf32>
    %585 = arith.addf %583, %584 : vector<8x128xf32>
    %586 = arith.mulf %447, %570 : vector<8x128xf32>
    %587 = arith.addf %585, %586 : vector<8x128xf32>
    %588 = arith.mulf %438, %564 : vector<8x128xf32>
    %589 = arith.mulf %450, %567 : vector<8x128xf32>
    %590 = arith.subf %588, %589 : vector<8x128xf32>
    %591 = arith.mulf %441, %570 : vector<8x128xf32>
    %592 = arith.addf %590, %591 : vector<8x128xf32>
    %593 = arith.mulf %453, %573 : vector<8x128xf32>
    %594 = arith.subf %592, %593 : vector<8x128xf32>
    %595 = arith.mulf %438, %567 : vector<8x128xf32>
    %596 = arith.mulf %450, %564 : vector<8x128xf32>
    %597 = arith.addf %595, %596 : vector<8x128xf32>
    %598 = arith.mulf %441, %573 : vector<8x128xf32>
    %599 = arith.addf %597, %598 : vector<8x128xf32>
    %600 = arith.mulf %453, %570 : vector<8x128xf32>
    %601 = arith.addf %599, %600 : vector<8x128xf32>
    %602 = arith.mulf %29, %580 : vector<8x128xf32>
    %603 = arith.mulf %37, %587 : vector<8x128xf32>
    %604 = arith.addf %602, %603 : vector<8x128xf32>
    %605 = arith.mulf %29, %587 : vector<8x128xf32>
    %606 = arith.mulf %37, %580 : vector<8x128xf32>
    %607 = arith.subf %605, %606 : vector<8x128xf32>
    %608 = arith.mulf %29, %594 : vector<8x128xf32>
    %609 = arith.mulf %37, %601 : vector<8x128xf32>
    %610 = arith.subf %608, %609 : vector<8x128xf32>
    %611 = arith.mulf %29, %601 : vector<8x128xf32>
    %612 = arith.mulf %37, %594 : vector<8x128xf32>
    %613 = arith.addf %611, %612 : vector<8x128xf32>
    %614 = arith.mulf %432, %604 : vector<8x128xf32>
    %615 = arith.mulf %444, %607 : vector<8x128xf32>
    %616 = arith.subf %614, %615 : vector<8x128xf32>
    %617 = arith.mulf %435, %610 : vector<8x128xf32>
    %618 = arith.addf %616, %617 : vector<8x128xf32>
    %619 = arith.mulf %447, %613 : vector<8x128xf32>
    %620 = arith.subf %618, %619 : vector<8x128xf32>
    %621 = arith.mulf %432, %607 : vector<8x128xf32>
    %622 = arith.mulf %444, %604 : vector<8x128xf32>
    %623 = arith.addf %621, %622 : vector<8x128xf32>
    %624 = arith.mulf %435, %613 : vector<8x128xf32>
    %625 = arith.addf %623, %624 : vector<8x128xf32>
    %626 = arith.mulf %447, %610 : vector<8x128xf32>
    %627 = arith.addf %625, %626 : vector<8x128xf32>
    %628 = arith.mulf %438, %604 : vector<8x128xf32>
    %629 = arith.mulf %450, %607 : vector<8x128xf32>
    %630 = arith.subf %628, %629 : vector<8x128xf32>
    %631 = arith.mulf %441, %610 : vector<8x128xf32>
    %632 = arith.addf %630, %631 : vector<8x128xf32>
    %633 = arith.mulf %453, %613 : vector<8x128xf32>
    %634 = arith.subf %632, %633 : vector<8x128xf32>
    %635 = arith.mulf %438, %607 : vector<8x128xf32>
    %636 = arith.mulf %450, %604 : vector<8x128xf32>
    %637 = arith.addf %635, %636 : vector<8x128xf32>
    %638 = arith.mulf %441, %613 : vector<8x128xf32>
    %639 = arith.addf %637, %638 : vector<8x128xf32>
    %640 = arith.mulf %453, %610 : vector<8x128xf32>
    %641 = arith.addf %639, %640 : vector<8x128xf32>
    %642 = arith.mulf %30, %620 : vector<8x128xf32>
    %643 = arith.mulf %38, %627 : vector<8x128xf32>
    %644 = arith.addf %642, %643 : vector<8x128xf32>
    %645 = arith.mulf %30, %627 : vector<8x128xf32>
    %646 = arith.mulf %38, %620 : vector<8x128xf32>
    %647 = arith.subf %645, %646 : vector<8x128xf32>
    %648 = arith.mulf %30, %634 : vector<8x128xf32>
    %649 = arith.mulf %38, %641 : vector<8x128xf32>
    %650 = arith.subf %648, %649 : vector<8x128xf32>
    %651 = arith.mulf %30, %641 : vector<8x128xf32>
    %652 = arith.mulf %38, %634 : vector<8x128xf32>
    %653 = arith.addf %651, %652 : vector<8x128xf32>
    %654 = arith.mulf %432, %644 : vector<8x128xf32>
    %655 = arith.mulf %444, %647 : vector<8x128xf32>
    %656 = arith.subf %654, %655 : vector<8x128xf32>
    %657 = arith.mulf %435, %650 : vector<8x128xf32>
    %658 = arith.addf %656, %657 : vector<8x128xf32>
    %659 = arith.mulf %447, %653 : vector<8x128xf32>
    %660 = arith.subf %658, %659 : vector<8x128xf32>
    %661 = arith.mulf %432, %647 : vector<8x128xf32>
    %662 = arith.mulf %444, %644 : vector<8x128xf32>
    %663 = arith.addf %661, %662 : vector<8x128xf32>
    %664 = arith.mulf %435, %653 : vector<8x128xf32>
    %665 = arith.addf %663, %664 : vector<8x128xf32>
    %666 = arith.mulf %447, %650 : vector<8x128xf32>
    %667 = arith.addf %665, %666 : vector<8x128xf32>
    %668 = arith.mulf %438, %644 : vector<8x128xf32>
    %669 = arith.mulf %450, %647 : vector<8x128xf32>
    %670 = arith.subf %668, %669 : vector<8x128xf32>
    %671 = arith.mulf %441, %650 : vector<8x128xf32>
    %672 = arith.addf %670, %671 : vector<8x128xf32>
    %673 = arith.mulf %453, %653 : vector<8x128xf32>
    %674 = arith.subf %672, %673 : vector<8x128xf32>
    %675 = arith.mulf %438, %647 : vector<8x128xf32>
    %676 = arith.mulf %450, %644 : vector<8x128xf32>
    %677 = arith.addf %675, %676 : vector<8x128xf32>
    %678 = arith.mulf %441, %653 : vector<8x128xf32>
    %679 = arith.addf %677, %678 : vector<8x128xf32>
    %680 = arith.mulf %453, %650 : vector<8x128xf32>
    %681 = arith.addf %679, %680 : vector<8x128xf32>
    %682 = arith.mulf %31, %660 : vector<8x128xf32>
    %683 = arith.mulf %39, %667 : vector<8x128xf32>
    %684 = arith.addf %682, %683 : vector<8x128xf32>
    %685 = arith.mulf %31, %667 : vector<8x128xf32>
    %686 = arith.mulf %39, %660 : vector<8x128xf32>
    %687 = arith.subf %685, %686 : vector<8x128xf32>
    %688 = arith.mulf %31, %674 : vector<8x128xf32>
    %689 = arith.mulf %39, %681 : vector<8x128xf32>
    %690 = arith.subf %688, %689 : vector<8x128xf32>
    %691 = arith.mulf %31, %681 : vector<8x128xf32>
    %692 = arith.mulf %39, %674 : vector<8x128xf32>
    %693 = arith.addf %691, %692 : vector<8x128xf32>
    %694 = arith.mulf %432, %684 : vector<8x128xf32>
    %695 = arith.mulf %444, %687 : vector<8x128xf32>
    %696 = arith.subf %694, %695 : vector<8x128xf32>
    %697 = arith.mulf %435, %690 : vector<8x128xf32>
    %698 = arith.addf %696, %697 : vector<8x128xf32>
    %699 = arith.mulf %447, %693 : vector<8x128xf32>
    %700 = arith.subf %698, %699 : vector<8x128xf32>
    %701 = arith.mulf %432, %687 : vector<8x128xf32>
    %702 = arith.mulf %444, %684 : vector<8x128xf32>
    %703 = arith.addf %701, %702 : vector<8x128xf32>
    %704 = arith.mulf %435, %693 : vector<8x128xf32>
    %705 = arith.addf %703, %704 : vector<8x128xf32>
    %706 = arith.mulf %447, %690 : vector<8x128xf32>
    %707 = arith.addf %705, %706 : vector<8x128xf32>
    %708 = arith.mulf %438, %684 : vector<8x128xf32>
    %709 = arith.mulf %450, %687 : vector<8x128xf32>
    %710 = arith.subf %708, %709 : vector<8x128xf32>
    %711 = arith.mulf %441, %690 : vector<8x128xf32>
    %712 = arith.addf %710, %711 : vector<8x128xf32>
    %713 = arith.mulf %453, %693 : vector<8x128xf32>
    %714 = arith.subf %712, %713 : vector<8x128xf32>
    %715 = arith.mulf %438, %687 : vector<8x128xf32>
    %716 = arith.mulf %450, %684 : vector<8x128xf32>
    %717 = arith.addf %715, %716 : vector<8x128xf32>
    %718 = arith.mulf %441, %693 : vector<8x128xf32>
    %719 = arith.addf %717, %718 : vector<8x128xf32>
    %720 = arith.mulf %453, %690 : vector<8x128xf32>
    %721 = arith.addf %719, %720 : vector<8x128xf32>
    %722 = arith.mulf %32, %700 : vector<8x128xf32>
    %723 = arith.mulf %40, %707 : vector<8x128xf32>
    %724 = arith.addf %722, %723 : vector<8x128xf32>
    %725 = arith.mulf %32, %707 : vector<8x128xf32>
    %726 = arith.mulf %40, %700 : vector<8x128xf32>
    %727 = arith.subf %725, %726 : vector<8x128xf32>
    %728 = arith.mulf %32, %714 : vector<8x128xf32>
    %729 = arith.mulf %40, %721 : vector<8x128xf32>
    %730 = arith.subf %728, %729 : vector<8x128xf32>
    %731 = arith.mulf %32, %721 : vector<8x128xf32>
    %732 = arith.mulf %40, %714 : vector<8x128xf32>
    %733 = arith.addf %731, %732 : vector<8x128xf32>
    %734 = arith.mulf %432, %724 : vector<8x128xf32>
    %735 = arith.mulf %444, %727 : vector<8x128xf32>
    %736 = arith.subf %734, %735 : vector<8x128xf32>
    %737 = arith.mulf %435, %730 : vector<8x128xf32>
    %738 = arith.addf %736, %737 : vector<8x128xf32>
    %739 = arith.mulf %447, %733 : vector<8x128xf32>
    %740 = arith.subf %738, %739 : vector<8x128xf32>
    %741 = arith.mulf %432, %727 : vector<8x128xf32>
    %742 = arith.mulf %444, %724 : vector<8x128xf32>
    %743 = arith.addf %741, %742 : vector<8x128xf32>
    %744 = arith.mulf %435, %733 : vector<8x128xf32>
    %745 = arith.addf %743, %744 : vector<8x128xf32>
    %746 = arith.mulf %447, %730 : vector<8x128xf32>
    %747 = arith.addf %745, %746 : vector<8x128xf32>
    %748 = arith.mulf %438, %724 : vector<8x128xf32>
    %749 = arith.mulf %450, %727 : vector<8x128xf32>
    %750 = arith.subf %748, %749 : vector<8x128xf32>
    %751 = arith.mulf %441, %730 : vector<8x128xf32>
    %752 = arith.addf %750, %751 : vector<8x128xf32>
    %753 = arith.mulf %453, %733 : vector<8x128xf32>
    %754 = arith.subf %752, %753 : vector<8x128xf32>
    %755 = arith.mulf %438, %727 : vector<8x128xf32>
    %756 = arith.mulf %450, %724 : vector<8x128xf32>
    %757 = arith.addf %755, %756 : vector<8x128xf32>
    %758 = arith.mulf %441, %733 : vector<8x128xf32>
    %759 = arith.addf %757, %758 : vector<8x128xf32>
    %760 = arith.mulf %453, %730 : vector<8x128xf32>
    %761 = arith.addf %759, %760 : vector<8x128xf32>
    %762 = arith.mulf %33, %740 : vector<8x128xf32>
    %763 = arith.mulf %41, %747 : vector<8x128xf32>
    %764 = arith.addf %762, %763 : vector<8x128xf32>
    %765 = arith.mulf %33, %747 : vector<8x128xf32>
    %766 = arith.mulf %41, %740 : vector<8x128xf32>
    %767 = arith.subf %765, %766 : vector<8x128xf32>
    %768 = arith.mulf %33, %754 : vector<8x128xf32>
    %769 = arith.mulf %41, %761 : vector<8x128xf32>
    %770 = arith.subf %768, %769 : vector<8x128xf32>
    %771 = arith.mulf %33, %761 : vector<8x128xf32>
    %772 = arith.mulf %41, %754 : vector<8x128xf32>
    %773 = arith.addf %771, %772 : vector<8x128xf32>
    %774 = arith.mulf %432, %764 : vector<8x128xf32>
    %775 = arith.mulf %444, %767 : vector<8x128xf32>
    %776 = arith.subf %774, %775 : vector<8x128xf32>
    %777 = arith.mulf %435, %770 : vector<8x128xf32>
    %778 = arith.addf %776, %777 : vector<8x128xf32>
    %779 = arith.mulf %447, %773 : vector<8x128xf32>
    %780 = arith.subf %778, %779 : vector<8x128xf32>
    %781 = arith.mulf %432, %767 : vector<8x128xf32>
    %782 = arith.mulf %444, %764 : vector<8x128xf32>
    %783 = arith.addf %781, %782 : vector<8x128xf32>
    %784 = arith.mulf %435, %773 : vector<8x128xf32>
    %785 = arith.addf %783, %784 : vector<8x128xf32>
    %786 = arith.mulf %447, %770 : vector<8x128xf32>
    %787 = arith.addf %785, %786 : vector<8x128xf32>
    %788 = arith.mulf %438, %764 : vector<8x128xf32>
    %789 = arith.mulf %450, %767 : vector<8x128xf32>
    %790 = arith.subf %788, %789 : vector<8x128xf32>
    %791 = arith.mulf %441, %770 : vector<8x128xf32>
    %792 = arith.addf %790, %791 : vector<8x128xf32>
    %793 = arith.mulf %453, %773 : vector<8x128xf32>
    %794 = arith.subf %792, %793 : vector<8x128xf32>
    %795 = arith.mulf %438, %767 : vector<8x128xf32>
    %796 = arith.mulf %450, %764 : vector<8x128xf32>
    %797 = arith.addf %795, %796 : vector<8x128xf32>
    %798 = arith.mulf %441, %773 : vector<8x128xf32>
    %799 = arith.addf %797, %798 : vector<8x128xf32>
    %800 = arith.mulf %453, %770 : vector<8x128xf32>
    %801 = arith.addf %799, %800 : vector<8x128xf32>
    %802 = arith.mulf %42, %780 : vector<8x128xf32>
    %803 = arith.mulf %43, %787 : vector<8x128xf32>
    %804 = arith.addf %802, %803 : vector<8x128xf32>
    %805 = arith.mulf %42, %794 : vector<8x128xf32>
    %806 = arith.mulf %43, %801 : vector<8x128xf32>
    %807 = arith.subf %805, %806 : vector<8x128xf32>
    %808 = arith.addf %804, %807 : vector<8x128xf32>
    %809 = arith.index_cast %429 : i32 to index
    %c0_46 = arith.constant 0 : index
    %810 = vector.load %arg4[%809, %c0_46] : memref<16x128xf32, #tpu.memory_space<vmem>>, vector<8x128xf32>
    tpu.vector_store %arg4[%809, %c0_46], %808 {strides = array<i32>} : memref<16x128xf32, #tpu.memory_space<vmem>>, vector<8x128xf32>,
    %c1_i32_47 = arith.constant 1 : i32
    return
  }
  func.func @transform_0(%arg0: i32) -> i32 {
    %c0_i32 = arith.constant 0 : i32
    %c0_i32_0 = arith.constant 0 : i32
    return %c0_i32 : i32
  }
  func.func @transform_1(%arg0: i32) -> i32 {
    %c0_i32 = arith.constant 0 : i32
    %c0_i32_0 = arith.constant 0 : i32
    return %c0_i32 : i32
  }
  func.func @transform_2(%arg0: i32) -> (i32, i32, i32) {
    %c0_i32 = arith.constant 0 : i32
    %c0_i32_0 = arith.constant 0 : i32
    %c0_i32_1 = arith.constant 0 : i32
    return %c0_i32, %arg0, %c0_i32_0 : i32, i32, i32
  }
  func.func @transform_3(%arg0: i32) -> (i32, i32) {
    %c0_i32 = arith.constant 0 : i32
    %c0_i32_0 = arith.constant 0 : i32
    return %arg0, %c0_i32 : i32, i32
  }
}

</mosaic_0001>

<bundles_post_ra>
// kernel: tpu_custom_call.1
= control target key start
LH: loop header
LB: loop body
LE: loop exit
PB: predicated region body
PF: predicated region fallthrough
CT: control target
= control target key end

     0   :  { %8 = vsyncpa [#allocation5], 0  ;;  %s1689_s0 = inlined_call_operand.hbm [shape: f32[10], index: 0, kind: input, shape index: {}]   ;;  %s1690_s1 = inlined_call_operand.hbm [shape: f32[10], index: 1, kind: input, shape index: {}]   ;;  %s1691_s2 = inlined_call_operand.hbm [shape: f32[8,16,128], index: 2, kind: input, shape index: {}]   ;;  %s1692_s3 = inlined_call_operand.hbm [shape: f32[16,128], index: 3, kind: output, shape index: {}]  }
   0x1   :  { %9 = vsyncpa [#allocation7], 0 }
   0x2   :  { %10 = vsyncpa [#allocation3], 0 }
   0x3   :  { %11 = vsyncpa [#allocation4], 0  ;;  %s17_s14 = sshll.u32 %s1689_s0, 4  ;;  %s26_s17 = sshll.u32 %s1690_s1, 4  ;;  %s18_s14 = int_to_ptr.hbm [resolvable:$true] %s17_s14  ;;  %s27_s17 = int_to_ptr.hbm [resolvable:$true] %s26_s17 }
   0x4   :  { %s1008_s18 = smov [#allocation2]   ;;  %s1009_s19 = smov [#allocation6]  }
   0x5   :  { %20 = dma.hbm_to_smem %s18_s14, 16, %s1008_s18, [#allocation5]  }
   0x6   :  { %29 = dma.hbm_to_smem %s27_s17, 16, %s1009_s19, [#allocation7]  }
   0x7   :  { %s34_s22 = sshll.u32 %s1691_s2, 4  ;;  %s1010_s23 = smov [#allocation8]   ;;  %s35_s22 = int_to_ptr.hbm [resolvable:$true] %s34_s22 }
   0x8   :  { %s36_s24 = sshll.u32 %s1010_s23, 4  ;;  %s1011_s25 = smov 128   ;;  %s37_s24 = int_to_ptr.vmem [resolvable:$true] %s36_s24 }
   0x9   :  { %s1012_s0 = smov 8  }
   0xa   :  { %42 = dma.hbm_to_vmem [thread:$0]  %s35_s22, 2048, %s37_s24, [#allocation3], %s1011_s25, %s1011_s25, %s1012_s0  }
   0xb   :  { %1000 = dma.done.wait [#allocation5], 16  }
   0xc   :  { %1001 = vsyncadd [#allocation5], 4294967280 }
   0xd   :  { %1002 = dma.done.wait [#allocation7], 16  }
   0xe   :  { %1003 = vsyncadd [#allocation7], 4294967280 }
   0xf   :  { %1004 = dma.done.wait [#allocation3], 2048  }
  0x10   :  { %1005 = vsyncadd [#allocation3], 4294965248 }
  0x11   :  { %55 = sfence }
  0x12   :  { %s56_s1 = sld [smem:[#allocation2]]  ;;  %v1056_v1 = vld [vmem:[#allocation8] sm:$0xff]  ;;  %v1060_v2 = vld [vmem:[#allocation8 + $0x10] sm:$0xff]  ;;  %v1085_v13 = vld [vmem:[#allocation8 + $0x8] sm:$0xff]  ;;  %s1013_s20 = smov [#allocation9]  }
  0x13   :  { %s896_s26 = sld [smem:[#allocation2 + $0x1]]  ;;  %v1062_v3 = vld [vmem:[#allocation8 + $0x40] sm:$0xff]  ;;  %v1064_v4 = vld [vmem:[#allocation8 + $0x50] sm:$0xff]  ;;  %v1087_v14 = vld [vmem:[#allocation8 + $0x18] sm:$0xff]  ;;  %s863_s21 = sshll.u32 %s1013_s20, 4  ;;  %s864_s21 = int_to_ptr.vmem [resolvable:$true] %s863_s21 }
  0x14   :  { %s897_s2 = sld [smem:[#allocation2 + $0x2]]  ;;  %v1068_v5 = vld [vmem:[#allocation8 + $0x20] sm:$0xff]  ;;  %v1070_v6 = vld [vmem:[#allocation8 + $0x30] sm:$0xff]  ;;  %v1096_v19 = vld [vmem:[#allocation8 + $0x28] sm:$0xff]  ;;  %s865_s24 = sshll.u32 %s1692_s3, 4  ;;  %s866_s24 = int_to_ptr.hbm [resolvable:$true] %s865_s24 }
  0x15   :  { %s898_s27 = sld [smem:[#allocation2 + $0x3]]  ;;  %v1072_v7 = vld [vmem:[#allocation8 + $0x60] sm:$0xff]  ;;  %v1082_v11 = vld [vmem:[#allocation8 + $0x70] sm:$0xff]  ;;  %v1098_v20 = vld [vmem:[#allocation8 + $0x48] sm:$0xff] }
  0x16   :  { %s899_s28 = sld [smem:[#allocation2 + $0x4]]  ;;  %v1100_v21 = vld [vmem:[#allocation8 + $0x58] sm:$0xff]  ;;  %v1112_v27 = vld [vmem:[#allocation8 + $0x68] sm:$0xff] }
  0x17   :  { %s1046_s29 = sld [smem:[#allocation2 + $0x5]]  ;;  %v1110_v26 = vld [vmem:[#allocation8 + $0x38] sm:$0xff] }
  0x18   :  { %s1048_s30 = sld [smem:[#allocation2 + $0x6]]  ;;  %s76_s4 = smul.f32 0.5, %s56_s1  ;;  %v1114_v28 = vld [vmem:[#allocation8 + $0x78] sm:$0xff] }
  0x19   :  { %s1050_s5 = sld [smem:[#allocation2 + $0x7]]  ;;  %v1076_v8 = vstv %s896_s26 }
  0x1a   :  { %s1052_s6 = sld [smem:[#allocation2 + $0x8]]  ;;  %v77_v0 = vstv %s76_s4  ;;  %v1078_v9 = vstv %s897_s2 }
  0x1b   :  { %s1054_s7 = sld [smem:[#allocation2 + $0x9]]  ;;  %v1080_v10 = vstv %s898_s27  ;;  %v122_v12 = vmul.f32 %v1056_v1, %v77_v0  ;;  %v125_v16 = vmul.f32 %v1060_v2, %v77_v0  ;;  %v130_v17 = vmul.f32 %v1062_v3, %v77_v0 }
  0x1c   :  { %s1058_s8 = sld [smem:[#allocation6]]  ;;  %v1091_v15 = vstv %s899_s28  ;;  %v134_v18 = vmul.f32 %v1064_v4, %v77_v0  ;;  %v136_v23 = vmul.f32 %v1068_v5, %v77_v0  ;;  %v139_v24 = vmul.f32 %v1070_v6, %v77_v0 }
  0x1d   :  { %s1066_s9 = sld [smem:[#allocation6 + $0x1]]  ;;  %v1105_v22 = vstv %s1046_s29  ;;  %v144_v25 = vmul.f32 %v1072_v7, %v77_v0  ;;  %v148_v30 = vmul.f32 %v1082_v11, %v77_v0  ;;  %v502_v31 = vmul.f32 %v1085_v13, %v77_v0 }
  0x1e   :  { %s1074_s10 = sld [smem:[#allocation6 + $0x2]]  ;;  %v1119_v29 = vstv %s1048_s30  ;;  %v505_v32 = vmul.f32 %v1087_v14, %v77_v0  ;;  %v510_v34 = vmul.f32 %v1098_v20, %v77_v0  ;;  %v1130_v35 = vmul.f32 %v1100_v21, %v77_v0 }
  0x1f   :  { %s1089_s11 = sld [smem:[#allocation6 + $0x3]]  ;;  %1701 = vst [vmem:[#allocation14_spill] sm:$0xff] %v1119_v29  ;;  %v1126_v33 = vstv %s1050_s5  ;;  %v1133_v36 = vmul.f32 %v1096_v19, %v77_v0  ;;  %v1140_v38 = vmul.f32 %v1110_v26, %v77_v0  ;;  %v1143_v39 = vmul.f32 %v1112_v27, %v77_v0 }
  0x20   :  { %s1102_s12 = sld [smem:[#allocation6 + $0x4]]  ;;  %1702 = vst [vmem:[#allocation15_spill] sm:$0xff] %v1126_v33  ;;  %v1137_v37 = vstv %s1052_s6  ;;  %v1146_v40 = vmul.f32 %v1114_v28, %v77_v0 }
  0x21   :  { %s1116_s13 = sld [smem:[#allocation6 + $0x5]]  ;;  %1703 = vst [vmem:[#allocation16_spill] sm:$0xff] %v1137_v37  ;;  %v1157_v44 = vstv %s1054_s7 }
  0x22   :  { %s910_s14 = sld [smem:[#allocation6 + $0x6]]  ;;  %s78_s15 = smul.f32 -0.5, %s1058_s8  ;;  %1704 = vst [vmem:[#allocation17_spill] sm:$0xff] %v1157_v44 }
  0x23   :  { %s911_s16 = sld [smem:[#allocation6 + $0x7]]  ;;  %s80_s17 = smul.f32 0.5, %s1058_s8  ;;  %v1151_v42 = vstv %s1066_s9 }
  0x24   :  { %s912_s18 = sld [smem:[#allocation6 + $0x8]]  ;;  %v1148_v41 = vstv %s78_s15  ;;  %v1154_v43 = vstv %s1074_s10 }
  0x25   :  { %s913_s19 = sld [smem:[#allocation6 + $0x9]]  ;;  %v1159_v45 = vstv %s80_s17  ;;  %v1162_v46 = vstv %s1089_s11  ;;  %v123_v47 = vmul.f32 %v1062_v3, %v1148_v41  ;;  %v129_v48 = vmul.f32 %v1056_v1, %v1148_v41 }
  0x26   :  { %v1169_v49 = vstv %s1102_s12  ;;  %v127_v50 = vmul.f32 %v1064_v4, %v1159_v45  ;;  %v132_v51 = vmul.f32 %v1060_v2, %v1159_v45  ;;  %v137_v52 = vmul.f32 %v1072_v7, %v1148_v41 }
  0x27   :  { %v1178_v53 = vstv %s1116_s13  ;;  %v124_v54 = vsub.f32 %v122_v12, %v123_v47  ;;  %v131_v55 = vadd.f32 %v130_v17, %v129_v48  ;;  %v141_v56 = vmul.f32 %v1082_v11, %v1159_v45 }
  0x28   :  { %v1182_v57 = vstv %s910_s14  ;;  %v138_v58 = vsub.f32 %v136_v23, %v137_v52  ;;  %v143_v59 = vmul.f32 %v1068_v5, %v1148_v41  ;;  %v146_v60 = vmul.f32 %v1070_v6, %v1159_v45 }
  0x29   :  { %1705 = vst [vmem:[#allocation18_spill] sm:$0xff] %v1182_v57  ;;  %v1188_v61 = vstv %s911_s16  ;;  %v126_v62 = vadd.f32 %v125_v16, %v124_v54  ;;  %v133_v63 = vadd.f32 %v132_v51, %v131_v55  ;;  %v503_v0 = vmul.f32 %v1098_v20, %v1148_v41 }
  0x2a   :  { %1706 = vst [vmem:[#allocation19_spill] sm:$0xff] %v1188_v61  ;;  %v1192_v12 = vstv %s912_s18  ;;  %v140_v17 = vadd.f32 %v139_v24, %v138_v58  ;;  %v145_v47 = vadd.f32 %v144_v25, %v143_v59  ;;  %v507_v23 = vmul.f32 %v1100_v21, %v1159_v45 }
  0x2b   :  { %1707 = vst [vmem:[#allocation20_spill] sm:$0xff] %v1192_v12  ;;  %v1196_v48 = vstv %s913_s19  ;;  %v128_v52 = vsub.f32 %v126_v62, %v127_v50  ;;  %v135_v44 = vadd.f32 %v134_v18, %v133_v63  ;;  %v504_v37 = vsub.f32 %v502_v31, %v503_v0 }
  0x2c   :  { %1708 = vst [vmem:[#allocation21_spill] sm:$0xff] %v1196_v48  ;;  %v142_v33 = vsub.f32 %v140_v17, %v141_v56  ;;  %v147_v57 = vadd.f32 %v146_v60, %v145_v47  ;;  %v509_v16 = vmul.f32 %v1085_v13, %v1148_v41  ;;  %v512_v51 = vmul.f32 %v1087_v14, %v1159_v45 }
  0x2d   :  { %v150_v54 = vmul.f32 %v128_v52, %v1076_v8  ;;  %v151_v24 = vmul.f32 %v135_v44, %v1151_v42  ;;  %v153_v25 = vmul.f32 %v135_v44, %v1076_v8  ;;  %v154_v55 = vmul.f32 %v128_v52, %v1151_v42 }
  0x2e   :  { %v149_v58 = vadd.f32 %v148_v30, %v147_v57  ;;  %v156_v18 = vmul.f32 %v142_v33, %v1076_v8  ;;  %v160_v31 = vmul.f32 %v142_v33, %v1151_v42  ;;  %v506_v50 = vadd.f32 %v505_v32, %v504_v37 }
  0x2f   :  { %v152_v56 = vadd.f32 %v151_v24, %v150_v54  ;;  %v155_v59 = vsub.f32 %v153_v25, %v154_v55  ;;  %v511_v60 = vadd.f32 %v510_v34, %v509_v16  ;;  %v517_v62 = vmul.f32 %v1112_v27, %v1148_v41 }
  0x30   :  { %v157_v63 = vmul.f32 %v149_v58, %v1151_v42  ;;  %v159_v0 = vmul.f32 %v149_v58, %v1076_v8  ;;  %v1212_v17 = vsub.f32 %v506_v50, %v507_v23  ;;  %v521_v30 = vmul.f32 %v1114_v28, %v1159_v45 }
  0x31   :  { %v162_v44 = vmul.f32 %v152_v56, %v1056_v1  ;;  %v163_v33 = vmul.f32 %v155_v59, %v1062_v3  ;;  %v169_v32 = vmul.f32 %v155_v59, %v1056_v1  ;;  %v170_v34 = vmul.f32 %v152_v56, %v1062_v3 }
  0x32   :  { %v158_v37 = vsub.f32 %v156_v18, %v157_v63  ;;  %v161_v57 = vadd.f32 %v160_v31, %v159_v0  ;;  %v176_v47 = vmul.f32 %v152_v56, %v1068_v5  ;;  %v177_v52 = vmul.f32 %v155_v59, %v1072_v7 }
  0x33   :  { %v164_v16 = vsub.f32 %v162_v44, %v163_v33  ;;  %v171_v23 = vadd.f32 %v170_v34, %v169_v32  ;;  %v183_v54 = vmul.f32 %v155_v59, %v1068_v5  ;;  %v184_v24 = vmul.f32 %v152_v56, %v1072_v7 }
  0x34   :  { %v165_v25 = vmul.f32 %v158_v37, %v1060_v2  ;;  %v167_v55 = vmul.f32 %v161_v57, %v1064_v4  ;;  %v172_v58 = vmul.f32 %v161_v57, %v1060_v2  ;;  %v174_v50 = vmul.f32 %v158_v37, %v1064_v4 }
  0x35   :  { %v178_v18 = vsub.f32 %v176_v47, %v177_v52  ;;  %v179_v31 = vmul.f32 %v158_v37, %v1070_v6  ;;  %v181_v63 = vmul.f32 %v161_v57, %v1082_v11  ;;  %v185_v0 = vadd.f32 %v184_v24, %v183_v54 }
  0x36   :  { %v166_v44 = vadd.f32 %v165_v25, %v164_v16  ;;  %v173_v33 = vadd.f32 %v172_v58, %v171_v23  ;;  %v186_v59 = vmul.f32 %v161_v57, %v1070_v6  ;;  %v188_v56 = vmul.f32 %v158_v37, %v1082_v11 }
  0x37   :  { %v180_v32 = vadd.f32 %v179_v31, %v178_v18  ;;  %v513_v34 = vadd.f32 %v512_v51, %v511_v60  ;;  %v518_v48 = vsub.f32 %v1133_v36, %v517_v62  ;;  %v523_v12 = vmul.f32 %v1096_v19, %v1148_v41 }
  0x38   :  { %v168_v61 = vsub.f32 %v166_v44, %v167_v55  ;;  %v175_v47 = vadd.f32 %v174_v50, %v173_v33  ;;  %v187_v52 = vadd.f32 %v186_v59, %v185_v0  ;;  %v526_v29 = vmul.f32 %v1110_v26, %v1159_v45 }
  0x39   :  { %v182_v54 = vsub.f32 %v180_v32, %v181_v63  ;;  %v515_v16 = vadd.f32 %v1130_v35, %v513_v34  ;;  %v520_v57 = vadd.f32 %v1140_v38, %v518_v48  ;;  %v525_v37 = vadd.f32 %v1143_v39, %v523_v12 }
  0x3a   :  { %v189_v23 = vadd.f32 %v188_v56, %v187_v52  ;;  %v190_v51 = vmul.f32 %v168_v61, %v1078_v9  ;;  %v191_v36 = vmul.f32 %v175_v47, %v1154_v43  ;;  %v193_v41 = vmul.f32 %v175_v47, %v1078_v9 }
  0x3b   :  { %v194_v60 = vmul.f32 %v168_v61, %v1154_v43  ;;  %v196_v62 = vmul.f32 %v182_v54, %v1078_v9  ;;  %v200_v45 = vmul.f32 %v182_v54, %v1154_v43  ;;  %v522_v24 = vsub.f32 %v520_v57, %v521_v30 }
  0x3c   :  { %v192_v25 = vadd.f32 %v191_v36, %v190_v51  ;;  %v197_v35 = vmul.f32 %v189_v23, %v1154_v43  ;;  %v199_v38 = vmul.f32 %v189_v23, %v1078_v9  ;;  %v527_v39 = vadd.f32 %v526_v29, %v525_v37 }
  0x3d   :  { %v195_v12 = vsub.f32 %v193_v41, %v194_v60  ;;  %v530_v48 = vmul.f32 %v1212_v17, %v1076_v8  ;;  %v531_v55 = vmul.f32 %v515_v16, %v1151_v42  ;;  %v533_v58 = vmul.f32 %v515_v16, %v1076_v8 }
  0x3e   :  { %v198_v61 = vsub.f32 %v196_v62, %v197_v35  ;;  %v201_v50 = vadd.f32 %v200_v45, %v199_v38  ;;  %v202_v18 = vmul.f32 %v192_v25, %v1056_v1  ;;  %v210_v30 = vmul.f32 %v192_v25, %v1062_v3 }
  0x3f   :  { %v203_v31 = vmul.f32 %v195_v12, %v1062_v3  ;;  %v209_v63 = vmul.f32 %v195_v12, %v1056_v1  ;;  %v216_v29 = vmul.f32 %v192_v25, %v1068_v5  ;;  %v217_v0 = vmul.f32 %v195_v12, %v1072_v7 }
  0x40   :  { %v205_v44 = vmul.f32 %v198_v61, %v1060_v2  ;;  %v207_v33 = vmul.f32 %v201_v50, %v1064_v4  ;;  %v212_v59 = vmul.f32 %v201_v50, %v1060_v2  ;;  %v214_v56 = vmul.f32 %v198_v61, %v1064_v4 }
  0x41   :  { %v204_v32 = vsub.f32 %v202_v18, %v203_v31  ;;  %v211_v34 = vadd.f32 %v210_v30, %v209_v63  ;;  %v218_v47 = vsub.f32 %v216_v29, %v217_v0  ;;  %v219_v52 = vmul.f32 %v198_v61, %v1070_v6 }
  0x42   :  { %v221_v54 = vmul.f32 %v201_v50, %v1082_v11  ;;  %v223_v16 = vmul.f32 %v195_v12, %v1068_v5  ;;  %v224_v57 = vmul.f32 %v192_v25, %v1072_v7  ;;  %v226_v37 = vmul.f32 %v201_v50, %v1070_v6 }
  0x43   :  { %v206_v23 = vadd.f32 %v205_v44, %v204_v32  ;;  %v213_v51 = vadd.f32 %v212_v59, %v211_v34  ;;  %v220_v36 = vadd.f32 %v219_v52, %v218_v47  ;;  %v228_v41 = vmul.f32 %v198_v61, %v1082_v11 }
  0x44   :  { %v225_v60 = vadd.f32 %v224_v57, %v223_v16  ;;  %v529_v62 = vadd.f32 %v1146_v40, %v527_v39  ;;  %v1269_v45 = vadd.f32 %v531_v55, %v530_v48  ;;  %v534_v35 = vmul.f32 %v1212_v17, %v1151_v42 }
  0x45   :  { %v208_v38 = vsub.f32 %v206_v23, %v207_v33  ;;  %v215_v18 = vadd.f32 %v214_v56, %v213_v51  ;;  %v222_v12 = vsub.f32 %v220_v36, %v221_v54  ;;  %v536_v25 = vmul.f32 %v522_v24, %v1076_v8 }
  0x46   :  { %v227_v30 = vadd.f32 %v226_v37, %v225_v60  ;;  %v1274_v50 = vsub.f32 %v533_v58, %v534_v35  ;;  %v537_v31 = vmul.f32 %v529_v62, %v1151_v42  ;;  %v539_v61 = vmul.f32 %v529_v62, %v1076_v8 }
  0x47   :  { %v230_v63 = vmul.f32 %v208_v38, %v1080_v10  ;;  %v231_v40 = vmul.f32 %v215_v18, %v1162_v46  ;;  %v233_v39 = vmul.f32 %v215_v18, %v1080_v10  ;;  %v234_v17 = vmul.f32 %v208_v38, %v1162_v46 }
  0x48   :  { %v229_v48 = vadd.f32 %v228_v41, %v227_v30  ;;  %v236_v55 = vmul.f32 %v222_v12, %v1080_v10  ;;  %v240_v29 = vmul.f32 %v222_v12, %v1162_v46  ;;  %v1284_v0 = vsub.f32 %v536_v25, %v537_v31 }
  0x49   :  { %v232_v58 = vadd.f32 %v231_v40, %v230_v63  ;;  %v235_v44 = vsub.f32 %v233_v39, %v234_v17  ;;  %v540_v33 = vmul.f32 %v522_v24, %v1151_v42  ;;  %v542_v8 = vmul.f32 %v1269_v45, %v1085_v13 }
  0x4a   :  { %v237_v59 = vmul.f32 %v229_v48, %v1162_v46  ;;  %v239_v56 = vmul.f32 %v229_v48, %v1080_v10  ;;  %v543_v32 = vmul.f32 %v1274_v50, %v1098_v20  ;;  %v545_v34 = vmul.f32 %v1284_v0, %v1087_v14 }
  0x4b   :  { %v242_v47 = vmul.f32 %v232_v58, %v1056_v1  ;;  %v243_v52 = vmul.f32 %v235_v44, %v1062_v3  ;;  %v249_v54 = vmul.f32 %v235_v44, %v1056_v1  ;;  %v250_v42 = vmul.f32 %v232_v58, %v1062_v3 }
  0x4c   :  { %v238_v24 = vsub.f32 %v236_v55, %v237_v59  ;;  %v241_v16 = vadd.f32 %v240_v29, %v239_v56  ;;  %v256_v57 = vmul.f32 %v232_v58, %v1068_v5  ;;  %v257_v37 = vmul.f32 %v235_v44, %v1072_v7 }
  0x4d   :  { %v244_v23 = vsub.f32 %v242_v47, %v243_v52  ;;  %v251_v51 = vadd.f32 %v250_v42, %v249_v54  ;;  %v263_v36 = vmul.f32 %v235_v44, %v1068_v5  ;;  %v264_v41 = vmul.f32 %v232_v58, %v1072_v7 }
  0x4e   :  { %v245_v60 = vmul.f32 %v238_v24, %v1060_v2  ;;  %v247_v62 = vmul.f32 %v241_v16, %v1064_v4  ;;  %v252_v35 = vmul.f32 %v241_v16, %v1060_v2  ;;  %v254_v38 = vmul.f32 %v238_v24, %v1064_v4 }
  0x4f   :  { %v258_v18 = vsub.f32 %v256_v57, %v257_v37  ;;  %v259_v12 = vmul.f32 %v238_v24, %v1070_v6  ;;  %v261_v25 = vmul.f32 %v241_v16, %v1082_v11  ;;  %v265_v30 = vadd.f32 %v264_v41, %v263_v36 }
  0x50   :  { %v246_v31 = vadd.f32 %v245_v60, %v244_v23  ;;  %v253_v63 = vadd.f32 %v252_v35, %v251_v51  ;;  %v266_v40 = vmul.f32 %v241_v16, %v1070_v6  ;;  %v268_v39 = vmul.f32 %v238_v24, %v1082_v11 }
  0x51   :  { %v260_v17 = vadd.f32 %v259_v12, %v258_v18  ;;  %v1311_v48 = vadd.f32 %v540_v33, %v539_v61  ;;  %v544_v55 = vsub.f32 %v542_v8, %v543_v32  ;;  %v549_v29 = vmul.f32 %v1274_v50, %v1085_v13 }
  0x52   :  { %v248_v58 = vsub.f32 %v246_v31, %v247_v62  ;;  %v255_v44 = vadd.f32 %v254_v38, %v253_v63  ;;  %v267_v59 = vadd.f32 %v266_v40, %v265_v30  ;;  %v550_v56 = vmul.f32 %v1269_v45, %v1098_v20 }
  0x53   :  { %v262_v47 = vsub.f32 %v260_v17, %v261_v25  ;;  %v546_v52 = vadd.f32 %v545_v34, %v544_v55  ;;  %v547_v54 = vmul.f32 %v1311_v48, %v1100_v21  ;;  %v552_v42 = vmul.f32 %v1311_v48, %v1087_v14 }
  0x54   :  { %v269_v61 = vadd.f32 %v268_v39, %v267_v59  ;;  %v270_v33 = vmul.f32 %v248_v58, %v1091_v15  ;;  %v271_v8 = vmul.f32 %v255_v44, %v1169_v49  ;;  %v273_v32 = vmul.f32 %v255_v44, %v1091_v15 }
  0x55   :  { %v274_v24 = vmul.f32 %v248_v58, %v1169_v49  ;;  %v276_v16 = vmul.f32 %v262_v47, %v1091_v15  ;;  %v280_v57 = vmul.f32 %v262_v47, %v1169_v49  ;;  %v1327_v34 = vsub.f32 %v546_v52, %v547_v54 }
  0x56   :  { %v272_v37 = vadd.f32 %v271_v8, %v270_v33  ;;  %v277_v23 = vmul.f32 %v269_v61, %v1169_v49  ;;  %v279_v51 = vmul.f32 %v269_v61, %v1091_v15  ;;  %v551_v36 = vadd.f32 %v550_v56, %v549_v29 }
  0x57   :  { %v275_v41 = vsub.f32 %v273_v32, %v274_v24  ;;  %v554_v60 = vmul.f32 %v1284_v0, %v1100_v21  ;;  %v556_v62 = vmul.f32 %v1269_v45, %v1096_v19  ;;  %v557_v35 = vmul.f32 %v1274_v50, %v1112_v27 }
  0x58   :  { %v278_v38 = vsub.f32 %v276_v16, %v277_v23  ;;  %v281_v18 = vadd.f32 %v280_v57, %v279_v51  ;;  %v282_v12 = vmul.f32 %v272_v37, %v1056_v1  ;;  %v290_v25 = vmul.f32 %v272_v37, %v1062_v3 }
  0x59   :  { %v283_v30 = vmul.f32 %v275_v41, %v1062_v3  ;;  %v289_v31 = vmul.f32 %v275_v41, %v1056_v1  ;;  %v296_v63 = vmul.f32 %v272_v37, %v1068_v5  ;;  %v297_v40 = vmul.f32 %v275_v41, %v1072_v7 }
  0x5a   :  { %v285_v39 = vmul.f32 %v278_v38, %v1060_v2  ;;  %v287_v17 = vmul.f32 %v281_v18, %v1064_v4  ;;  %v292_v55 = vmul.f32 %v281_v18, %v1060_v2  ;;  %v294_v29 = vmul.f32 %v278_v38, %v1064_v4 }
  0x5b   :  { %v284_v58 = vsub.f32 %v282_v12, %v283_v30  ;;  %v291_v44 = vadd.f32 %v290_v25, %v289_v31  ;;  %v298_v59 = vsub.f32 %v296_v63, %v297_v40  ;;  %v299_v56 = vmul.f32 %v278_v38, %v1070_v6 }
  0x5c   :  { %v301_v47 = vmul.f32 %v281_v18, %v1082_v11  ;;  %v303_v52 = vmul.f32 %v275_v41, %v1068_v5  ;;  %v304_v54 = vmul.f32 %v272_v37, %v1072_v7  ;;  %v306_v61 = vmul.f32 %v281_v18, %v1070_v6 }
  0x5d   :  { %v286_v33 = vadd.f32 %v285_v39, %v284_v58  ;;  %v293_v8 = vadd.f32 %v292_v55, %v291_v44  ;;  %v300_v32 = vadd.f32 %v299_v56, %v298_v59  ;;  %v308_v24 = vmul.f32 %v278_v38, %v1082_v11 }
  0x5e   :  { %v305_v16 = vadd.f32 %v304_v54, %v303_v52  ;;  %v553_v57 = vadd.f32 %v552_v42, %v551_v36  ;;  %v558_v23 = vsub.f32 %v556_v62, %v557_v35  ;;  %v559_v51 = vmul.f32 %v1284_v0, %v1110_v26 }
  0x5f   :  { %v288_v12 = vsub.f32 %v286_v33, %v287_v17  ;;  %v295_v25 = vadd.f32 %v294_v29, %v293_v8  ;;  %v302_v30 = vsub.f32 %v300_v32, %v301_v47  ;;  %v561_v41 = vmul.f32 %v1311_v48, %v1114_v28 }
  0x60   :  { %v307_v37 = vadd.f32 %v306_v61, %v305_v16  ;;  %v555_v31 = vadd.f32 %v554_v60, %v553_v57  ;;  %v560_v18 = vadd.f32 %v559_v51, %v558_v23  ;;  %v563_v63 = vmul.f32 %v1274_v50, %v1096_v19 }
  0x61   :  { %v310_v38 = vmul.f32 %v288_v12, %v1105_v22  ;;  %v311_v42 = vmul.f32 %v295_v25, %v1178_v53  ;;  %v313_v36 = vmul.f32 %v295_v25, %v1105_v22  ;;  %v314_v62 = vmul.f32 %v288_v12, %v1178_v53 }
  0x62   :  { %v309_v35 = vadd.f32 %v308_v24, %v307_v37  ;;  %v316_v40 = vmul.f32 %v302_v30, %v1105_v22  ;;  %v320_v39 = vmul.f32 %v302_v30, %v1178_v53  ;;  %v562_v17 = vsub.f32 %v560_v18, %v561_v41 }
  0x63   :  { %v312_v55 = vadd.f32 %v311_v42, %v310_v38  ;;  %v315_v60 = vsub.f32 %v313_v36, %v314_v62  ;;  %v564_v29 = vmul.f32 %v1269_v45, %v1112_v27  ;;  %v566_v50 = vmul.f32 %v1311_v48, %v1110_v26 }
  0x64   :  { %v317_v58 = vmul.f32 %v309_v35, %v1178_v53  ;;  %v319_v44 = vmul.f32 %v309_v35, %v1105_v22  ;;  %v568_v59 = vmul.f32 %v1284_v0, %v1114_v28  ;;  %v570_v56 = vmul.f32 %v1327_v34, %v1078_v9 }
  0x65   :  { %v322_v47 = vmul.f32 %v312_v55, %v1056_v1  ;;  %v323_v52 = vmul.f32 %v315_v60, %v1062_v3  ;;  %v329_v54 = vmul.f32 %v315_v60, %v1056_v1  ;;  %v330_v45 = vmul.f32 %v312_v55, %v1062_v3 }
  0x66   :  { %v318_v61 = vsub.f32 %v316_v40, %v317_v58  ;;  %v321_v48 = vadd.f32 %v320_v39, %v319_v44  ;;  %v336_v33 = vmul.f32 %v312_v55, %v1068_v5  ;;  %v337_v8 = vmul.f32 %v315_v60, %v1072_v7 }
  0x67   :  { %v324_v32 = vsub.f32 %v322_v47, %v323_v52  ;;  %v331_v24 = vadd.f32 %v330_v45, %v329_v54  ;;  %v343_v0 = vmul.f32 %v315_v60, %v1068_v5  ;;  %v344_v16 = vmul.f32 %v312_v55, %v1072_v7 }
  0x68   :  { %v325_v57 = vmul.f32 %v318_v61, %v1060_v2  ;;  %v327_v23 = vmul.f32 %v321_v48, %v1064_v4  ;;  %v332_v51 = vmul.f32 %v321_v48, %v1060_v2  ;;  %v334_v12 = vmul.f32 %v318_v61, %v1064_v4 }
  0x69   :  { %v338_v25 = vsub.f32 %v336_v33, %v337_v8  ;;  %v339_v30 = vmul.f32 %v318_v61, %v1070_v6  ;;  %v341_v41 = vmul.f32 %v321_v48, %v1082_v11  ;;  %v345_v37 = vadd.f32 %v344_v16, %v343_v0 }
  0x6a   :  { %v326_v18 = vadd.f32 %v325_v57, %v324_v32  ;;  %v333_v38 = vadd.f32 %v332_v51, %v331_v24  ;;  %v346_v42 = vmul.f32 %v321_v48, %v1070_v6  ;;  %v348_v36 = vmul.f32 %v318_v61, %v1082_v11  ;;  %v1709_v61 = vld [vmem:[#allocation14_spill] sm:$0xff] }
  0x6b   :  { %v340_v62 = vadd.f32 %v339_v30, %v338_v25  ;;  %v565_v35 = vadd.f32 %v564_v29, %v563_v63  ;;  %v571_v40 = vmul.f32 %v555_v31, %v1154_v43  ;;  %v573_v39 = vmul.f32 %v555_v31, %v1078_v9  ;;  %v1710_v63 = vld [vmem:[#allocation18_spill] sm:$0xff] }
  0x6c   :  { %v328_v55 = vsub.f32 %v326_v18, %v327_v23  ;;  %v335_v60 = vadd.f32 %v334_v12, %v333_v38  ;;  %v347_v58 = vadd.f32 %v346_v42, %v345_v37  ;;  %v574_v44 = vmul.f32 %v1327_v34, %v1154_v43 }
  0x6d   :  { %v342_v47 = vsub.f32 %v340_v62, %v341_v41  ;;  %v567_v52 = vadd.f32 %v566_v50, %v565_v35  ;;  %v1395_v54 = vadd.f32 %v571_v40, %v570_v56  ;;  %v576_v45 = vmul.f32 %v562_v17, %v1078_v9 }
  0x6e   :  { %v349_v48 = vadd.f32 %v348_v36, %v347_v58  ;;  %v350_v33 = vmul.f32 %v328_v55, %v1709_v61  ;;  %v351_v29 = vmul.f32 %v335_v60, %v1710_v63  ;;  %v353_v8 = vmul.f32 %v335_v60, %v1709_v61 }
  0x6f   :  { %v354_v31 = vmul.f32 %v328_v55, %v1710_v63  ;;  %v356_v32 = vmul.f32 %v342_v47, %v1709_v61  ;;  %v360_v24 = vmul.f32 %v342_v47, %v1710_v63  ;;  %v569_v34 = vadd.f32 %v568_v59, %v567_v52 }
  0x70   :  { %v352_v0 = vadd.f32 %v351_v29, %v350_v33  ;;  %v357_v50 = vmul.f32 %v349_v48, %v1710_v63  ;;  %v359_v56 = vmul.f32 %v349_v48, %v1709_v61  ;;  %v1406_v16 = vsub.f32 %v573_v39, %v574_v44 }
  0x71   :  { %v355_v57 = vsub.f32 %v353_v8, %v354_v31  ;;  %v577_v23 = vmul.f32 %v569_v34, %v1154_v43  ;;  %v579_v51 = vmul.f32 %v569_v34, %v1078_v9  ;;  %v580_v12 = vmul.f32 %v562_v17, %v1154_v43 }
  0x72   :  { %v358_v25 = vsub.f32 %v356_v32, %v357_v50  ;;  %v361_v30 = vadd.f32 %v360_v24, %v359_v56  ;;  %v362_v41 = vmul.f32 %v352_v0, %v1056_v1  ;;  %v370_v59 = vmul.f32 %v352_v0, %v1062_v3 }
  0x73   :  { %v363_v37 = vmul.f32 %v355_v57, %v1062_v3  ;;  %v369_v18 = vmul.f32 %v355_v57, %v1056_v1  ;;  %v376_v38 = vmul.f32 %v352_v0, %v1068_v5  ;;  %v377_v42 = vmul.f32 %v355_v57, %v1072_v7 }
  0x74   :  { %v365_v36 = vmul.f32 %v358_v25, %v1060_v2  ;;  %v367_v9 = vmul.f32 %v361_v30, %v1064_v4  ;;  %v372_v43 = vmul.f32 %v361_v30, %v1060_v2  ;;  %v374_v17 = vmul.f32 %v358_v25, %v1064_v4 }
  0x75   :  { %v364_v62 = vsub.f32 %v362_v41, %v363_v37  ;;  %v371_v35 = vadd.f32 %v370_v59, %v369_v18  ;;  %v378_v40 = vsub.f32 %v376_v38, %v377_v42  ;;  %v379_v39 = vmul.f32 %v358_v25, %v1070_v6 }
  0x76   :  { %v381_v55 = vmul.f32 %v361_v30, %v1082_v11  ;;  %v383_v60 = vmul.f32 %v355_v57, %v1068_v5  ;;  %v384_v58 = vmul.f32 %v352_v0, %v1072_v7  ;;  %v386_v44 = vmul.f32 %v361_v30, %v1070_v6 }
  0x77   :  { %v366_v47 = vadd.f32 %v365_v36, %v364_v62  ;;  %v373_v52 = vadd.f32 %v372_v43, %v371_v35  ;;  %v380_v48 = vadd.f32 %v379_v39, %v378_v40  ;;  %v388_v33 = vmul.f32 %v358_v25, %v1082_v11 }
  0x78   :  { %v385_v29 = vadd.f32 %v384_v58, %v383_v60  ;;  %v1427_v8 = vsub.f32 %v576_v45, %v577_v23  ;;  %v1429_v31 = vadd.f32 %v580_v12, %v579_v51  ;;  %v582_v32 = vmul.f32 %v1395_v54, %v1085_v13  ;;  %v1711_v23 = vld [vmem:[#allocation15_spill] sm:$0xff] }
  0x79   :  { %v368_v24 = vsub.f32 %v366_v47, %v367_v9  ;;  %v375_v34 = vadd.f32 %v374_v17, %v373_v52  ;;  %v382_v50 = vsub.f32 %v380_v48, %v381_v55  ;;  %v583_v0 = vmul.f32 %v1406_v16, %v1098_v20  ;;  %v1712_v12 = vld [vmem:[#allocation19_spill] sm:$0xff] }
  0x7a   :  { %v387_v56 = vadd.f32 %v386_v44, %v385_v29  ;;  %v585_v57 = vmul.f32 %v1427_v8, %v1087_v14  ;;  %v587_v25 = vmul.f32 %v1429_v31, %v1100_v21  ;;  %v589_v45 = vmul.f32 %v1406_v16, %v1085_v13 }
  0x7b   :  { %v390_v51 = vmul.f32 %v368_v24, %v1711_v23  ;;  %v391_v30 = vmul.f32 %v375_v34, %v1712_v12  ;;  %v393_v41 = vmul.f32 %v375_v34, %v1711_v23  ;;  %v394_v59 = vmul.f32 %v368_v24, %v1712_v12 }
  0x7c   :  { %v389_v37 = vadd.f32 %v388_v33, %v387_v56  ;;  %v396_v18 = vmul.f32 %v382_v50, %v1711_v23  ;;  %v400_v38 = vmul.f32 %v382_v50, %v1712_v12  ;;  %v584_v42 = vsub.f32 %v582_v32, %v583_v0 }
  0x7d   :  { %v392_v36 = vadd.f32 %v391_v30, %v390_v51  ;;  %v395_v9 = vsub.f32 %v393_v41, %v394_v59  ;;  %v590_v43 = vmul.f32 %v1395_v54, %v1098_v20  ;;  %v592_v17 = vmul.f32 %v1429_v31, %v1087_v14 }
  0x7e   :  { %v397_v62 = vmul.f32 %v389_v37, %v1712_v12  ;;  %v399_v35 = vmul.f32 %v389_v37, %v1711_v23  ;;  %v586_v40 = vadd.f32 %v585_v57, %v584_v42  ;;  %v594_v39 = vmul.f32 %v1427_v8, %v1100_v21 }
  0x7f   :  { %v402_v55 = vmul.f32 %v392_v36, %v1056_v1  ;;  %v403_v60 = vmul.f32 %v395_v9, %v1062_v3  ;;  %v409_v58 = vmul.f32 %v395_v9, %v1056_v1  ;;  %v410_v44 = vmul.f32 %v392_v36, %v1062_v3 }
  0x80   :  { %v398_v47 = vsub.f32 %v396_v18, %v397_v62  ;;  %v401_v52 = vadd.f32 %v400_v38, %v399_v35  ;;  %v416_v14 = vmul.f32 %v392_v36, %v1068_v5  ;;  %v417_v48 = vmul.f32 %v395_v9, %v1072_v7 }
  0x81   :  { %v404_v33 = vsub.f32 %v402_v55, %v403_v60  ;;  %v411_v29 = vadd.f32 %v410_v44, %v409_v58  ;;  %v423_v32 = vmul.f32 %v395_v9, %v1068_v5  ;;  %v424_v24 = vmul.f32 %v392_v36, %v1072_v7 }
  0x82   :  { %v405_v34 = vmul.f32 %v398_v47, %v1060_v2  ;;  %v407_v50 = vmul.f32 %v401_v52, %v1064_v4  ;;  %v412_v0 = vmul.f32 %v401_v52, %v1060_v2  ;;  %v414_v56 = vmul.f32 %v398_v47, %v1064_v4 }
  0x83   :  { %v418_v57 = vsub.f32 %v416_v14, %v417_v48  ;;  %v419_v51 = vmul.f32 %v398_v47, %v1070_v6  ;;  %v421_v30 = vmul.f32 %v401_v52, %v1082_v11  ;;  %v425_v41 = vadd.f32 %v424_v24, %v423_v32 }
  0x84   :  { %v406_v59 = vadd.f32 %v405_v34, %v404_v33  ;;  %v413_v37 = vadd.f32 %v412_v0, %v411_v29  ;;  %v426_v18 = vmul.f32 %v401_v52, %v1070_v6  ;;  %v428_v38 = vmul.f32 %v398_v47, %v1082_v11 }
  0x85   :  { %v420_v42 = vadd.f32 %v419_v51, %v418_v57  ;;  %v1471_v36 = vsub.f32 %v586_v40, %v587_v25  ;;  %v591_v9 = vadd.f32 %v590_v43, %v589_v45  ;;  %v596_v62 = vmul.f32 %v1395_v54, %v1096_v19  ;;  %v1713_v40 = vld [vmem:[#allocation16_spill] sm:$0xff] }
  0x86   :  { %v408_v35 = vsub.f32 %v406_v59, %v407_v50  ;;  %v415_v55 = vadd.f32 %v414_v56, %v413_v37  ;;  %v427_v60 = vadd.f32 %v426_v18, %v425_v41  ;;  %v597_v58 = vmul.f32 %v1406_v16, %v1112_v27  ;;  %v1714_v43 = vld [vmem:[#allocation20_spill] sm:$0xff] }
  0x87   :  { %v422_v44 = vsub.f32 %v420_v42, %v421_v30  ;;  %v593_v14 = vadd.f32 %v592_v17, %v591_v9  ;;  %v599_v52 = vmul.f32 %v1427_v8, %v1110_v26  ;;  %v601_v47 = vmul.f32 %v1429_v31, %v1114_v28 }
  0x88   :  { %v429_v25 = vadd.f32 %v428_v38, %v427_v60  ;;  %v430_v45 = vmul.f32 %v408_v35, %v1713_v40  ;;  %v431_v48 = vmul.f32 %v415_v55, %v1714_v43  ;;  %v433_v33 = vmul.f32 %v415_v55, %v1713_v40 }
  0x89   :  { %v434_v29 = vmul.f32 %v408_v35, %v1714_v43  ;;  %v436_v32 = vmul.f32 %v422_v44, %v1713_v40  ;;  %v440_v24 = vmul.f32 %v422_v44, %v1714_v43  ;;  %v595_v17 = vadd.f32 %v594_v39, %v593_v14 }
  0x8a   :  { %v432_v34 = vadd.f32 %v431_v48, %v430_v45  ;;  %v437_v50 = vmul.f32 %v429_v25, %v1714_v43  ;;  %v439_v0 = vmul.f32 %v429_v25, %v1713_v40  ;;  %v598_v56 = vsub.f32 %v596_v62, %v597_v58 }
  0x8b   :  { %v435_v57 = vsub.f32 %v433_v33, %v434_v29  ;;  %v603_v51 = vmul.f32 %v1406_v16, %v1096_v19  ;;  %v604_v30 = vmul.f32 %v1395_v54, %v1112_v27  ;;  %v606_v41 = vmul.f32 %v1429_v31, %v1110_v26 }
  0x8c   :  { %v438_v59 = vsub.f32 %v436_v32, %v437_v50  ;;  %v441_v37 = vadd.f32 %v440_v24, %v439_v0  ;;  %v442_v39 = vmul.f32 %v432_v34, %v1056_v1  ;;  %v450_v18 = vmul.f32 %v432_v34, %v1062_v3 }
  0x8d   :  { %v443_v38 = vmul.f32 %v435_v57, %v1062_v3  ;;  %v449_v42 = vmul.f32 %v435_v57, %v1056_v1  ;;  %v456_v9 = vmul.f32 %v432_v34, %v1068_v5  ;;  %v457_v16 = vmul.f32 %v435_v57, %v1072_v7 }
  0x8e   :  { %v445_v62 = vmul.f32 %v438_v59, %v1060_v2  ;;  %v447_v54 = vmul.f32 %v441_v37, %v1064_v4  ;;  %v452_v31 = vmul.f32 %v441_v37, %v1060_v2  ;;  %v454_v35 = vmul.f32 %v438_v59, %v1064_v4 }
  0x8f   :  { %v444_v55 = vsub.f32 %v442_v39, %v443_v38  ;;  %v451_v60 = vadd.f32 %v450_v18, %v449_v42  ;;  %v458_v58 = vsub.f32 %v456_v9, %v457_v16  ;;  %v459_v44 = vmul.f32 %v438_v59, %v1070_v6 }
  0x90   :  { %v461_v3 = vmul.f32 %v441_v37, %v1082_v11  ;;  %v463_v1 = vmul.f32 %v435_v57, %v1068_v5  ;;  %v464_v14 = vmul.f32 %v432_v34, %v1072_v7  ;;  %v466_v25 = vmul.f32 %v441_v37, %v1070_v6  ;;  %v1715_v37 = vld [vmem:[#allocation17_spill] sm:$0xff] }
  0x91   :  { %v446_v45 = vadd.f32 %v445_v62, %v444_v55  ;;  %v453_v48 = vadd.f32 %v452_v31, %v451_v60  ;;  %v460_v33 = vadd.f32 %v459_v44, %v458_v58  ;;  %v468_v2 = vmul.f32 %v438_v59, %v1082_v11  ;;  %v1716_v11 = vld [vmem:[#allocation21_spill] sm:$0xff] }
  0x92   :  { %v465_v29 = vadd.f32 %v464_v14, %v463_v1  ;;  %v600_v4 = vadd.f32 %v599_v52, %v598_v56  ;;  %v605_v32 = vadd.f32 %v604_v30, %v603_v51  ;;  %v608_v24 = vmul.f32 %v1427_v8, %v1114_v28 }
  0x93   :  { %v448_v50 = vsub.f32 %v446_v45, %v447_v54  ;;  %v455_v0 = vadd.f32 %v454_v35, %v453_v48  ;;  %v462_v39 = vsub.f32 %v460_v33, %v461_v3  ;;  %v610_v5 = vmul.f32 %v1471_v36, %v1080_v10  ;;  %v1532_v3 = vld [vmem:[#allocation8 + $0x8] sm:$0xff] }
  0x94   :  { %v467_v7 = vadd.f32 %v466_v25, %v465_v29  ;;  %v602_v34 = vsub.f32 %v600_v4, %v601_v47  ;;  %v607_v6 = vadd.f32 %v606_v41, %v605_v32  ;;  %v611_v57 = vmul.f32 %v595_v17, %v1162_v46  ;;  %v1537_v25 = vld [vmem:[#allocation8 + $0x18] sm:$0xff] }
  0x95   :  { %v470_v18 = vmul.f32 %v448_v50, %v1715_v37  ;;  %v471_v59 = vmul.f32 %v455_v0, %v1716_v11  ;;  %v473_v52 = vmul.f32 %v462_v39, %v1715_v37  ;;  %v613_v56 = vmul.f32 %v595_v17, %v1080_v10  ;;  %v1547_v0 = vld [vmem:[#allocation8 + $0x38] sm:$0xff] }
  0x96   :  { %v469_v8 = vadd.f32 %v468_v2, %v467_v7  ;;  %v609_v51 = vadd.f32 %v608_v24, %v607_v6  ;;  %v612_v30 = vadd.f32 %v611_v57, %v610_v5  ;;  %v614_v38 = vmul.f32 %v1471_v36, %v1162_v46  ;;  %v1550_v39 = vld [vmem:[#allocation8 + $0x78] sm:$0xff] }
  0x97   :  { %v472_v42 = vadd.f32 %v471_v59, %v470_v18  ;;  %v616_v47 = vmul.f32 %v602_v34, %v1080_v10  ;;  %v620_v41 = vmul.f32 %v602_v34, %v1162_v46 }
  0x98   :  { %v474_v9 = vmul.f32 %v469_v8, %v1716_v11  ;;  %v615_v16 = vsub.f32 %v613_v56, %v614_v38  ;;  %v617_v62 = vmul.f32 %v609_v51, %v1162_v46  ;;  %v619_v54 = vmul.f32 %v609_v51, %v1080_v10 }
  0x99   :  { %v622_v17 = vmul.f32 %v612_v30, %v1085_v13  ;;  %v630_v31 = vmul.f32 %v612_v30, %v1098_v20  ;;  %v636_v35 = vmul.f32 %v612_v30, %v1096_v19  ;;  %v644_v36 = vmul.f32 %v612_v30, %v1112_v27 }
  0x9a   :  { %v475_v55 = vsub.f32 %v473_v52, %v474_v9  ;;  %v618_v60 = vsub.f32 %v616_v47, %v617_v62  ;;  %v621_v58 = vadd.f32 %v620_v41, %v619_v54  ;;  %v623_v44 = vmul.f32 %v615_v16, %v1098_v20  ;;  %v1542_v20 = vld [vmem:[#allocation8 + $0x58] sm:$0xff]  ;;  %v1562_v62 = vld [vmem:[#allocation8 + $0x48] sm:$0xff] }
  0x9b   :  { %v629_v1 = vmul.f32 %v1532_v3, %v615_v16  ;;  %v637_v46 = vmul.f32 %v615_v16, %v1112_v27  ;;  %v643_v10 = vmul.f32 %v615_v16, %v1096_v19 }
  0x9c   :  { %v476_v13 = vadd.f32 %v475_v55, %v472_v42  ;;  %v624_v14 = vsub.f32 %v622_v17, %v623_v44  ;;  %v625_v45 = vmul.f32 %v1537_v25, %v618_v60  ;;  %v627_v48 = vmul.f32 %v621_v58, %v1100_v21  ;;  %v1570_v55 = vld [vmem:[#allocation8 + $0x68] sm:$0xff] }
  0x9d   :  { %v631_v33 = vadd.f32 %v630_v31, %v629_v1  ;;  %v632_v2 = vmul.f32 %v1537_v25, %v621_v58  ;;  %v634_v29 = vmul.f32 %v1542_v20, %v618_v60  ;;  %v638_v4 = vsub.f32 %v636_v35, %v637_v46  ;;  %v1567_v35 = vld [vmem:[#allocation8 + $0x28] sm:$0xff] }
  0x9e   :  { %477 = vst [vmem:[#allocation9] sm:$0xff] %v476_v13  ;;  %v626_v27 = vadd.f32 %v625_v45, %v624_v14  ;;  %v639_v19 = vmul.f32 %v618_v60, %v1110_v26  ;;  %v641_v32 = vmul.f32 %v621_v58, %v1114_v28  ;;  %v645_v24 = vadd.f32 %v644_v36, %v643_v10 }
  0x9f   :  { %v633_v50 = vadd.f32 %v632_v2, %v631_v33  ;;  %v646_v21 = vmul.f32 %v1547_v0, %v621_v58  ;;  %v648_v5 = vmul.f32 %v1550_v39, %v618_v60 }
  0xa0   :  { %v628_v7 = vsub.f32 %v626_v27, %v627_v48  ;;  %v640_v34 = vadd.f32 %v639_v19, %v638_v4 }
  0xa1   :  { %v635_v6 = vadd.f32 %v634_v29, %v633_v50  ;;  %v647_v57 = vadd.f32 %v646_v21, %v645_v24 }
  0xa2   :  { %v642_v18 = vsub.f32 %v640_v34, %v641_v32  ;;  %v650_v59 = vmul.f32 %v628_v7, %v1091_v15  ;;  %v654_v26 = vmul.f32 %v628_v7, %v1169_v49 }
  0xa3   :  { %v649_v28 = vadd.f32 %v648_v5, %v647_v57  ;;  %v651_v52 = vmul.f32 %v635_v6, %v1169_v49  ;;  %v653_v56 = vmul.f32 %v635_v6, %v1091_v15 }
  0xa4   :  { %v656_v8 = vmul.f32 %v642_v18, %v1091_v15  ;;  %v660_v51 = vmul.f32 %v642_v18, %v1169_v49 }
  0xa5   :  { %v652_v30 = vadd.f32 %v651_v52, %v650_v59  ;;  %v655_v38 = vsub.f32 %v653_v56, %v654_v26  ;;  %v657_v42 = vmul.f32 %v649_v28, %v1169_v49  ;;  %v659_v47 = vmul.f32 %v649_v28, %v1091_v15 }
  0xa7   :  { %v658_v41 = vsub.f32 %v656_v8, %v657_v42  ;;  %v661_v9 = vadd.f32 %v660_v51, %v659_v47  ;;  %v662_v16 = vmul.f32 %v1532_v3, %v652_v30  ;;  %v663_v54 = vmul.f32 %v1562_v62, %v655_v38 }
  0xa8   :  { %v669_v17 = vmul.f32 %v1532_v3, %v655_v38  ;;  %v670_v31 = vmul.f32 %v1562_v62, %v652_v30  ;;  %v676_v36 = vmul.f32 %v1567_v35, %v652_v30  ;;  %v677_v15 = vmul.f32 %v1570_v55, %v655_v38 }
  0xa9   :  { %v664_v49 = vsub.f32 %v662_v16, %v663_v54  ;;  %v665_v60 = vmul.f32 %v1537_v25, %v658_v41  ;;  %v667_v58 = vmul.f32 %v1542_v20, %v661_v9  ;;  %v672_v44 = vmul.f32 %v1537_v25, %v661_v9 }
  0xaa   :  { %v671_v1 = vadd.f32 %v670_v31, %v669_v17  ;;  %v674_v46 = vmul.f32 %v1542_v20, %v658_v41  ;;  %v678_v10 = vsub.f32 %v676_v36, %v677_v15  ;;  %v679_v13 = vmul.f32 %v1547_v0, %v658_v41 }
  0xab   :  { %v666_v14 = vadd.f32 %v665_v60, %v664_v49  ;;  %v681_v45 = vmul.f32 %v1550_v39, %v661_v9  ;;  %v683_v48 = vmul.f32 %v1567_v35, %v655_v38  ;;  %v684_v33 = vmul.f32 %v1570_v55, %v652_v30 }
  0xac   :  { %v673_v2 = vadd.f32 %v672_v44, %v671_v1  ;;  %v680_v29 = vadd.f32 %v679_v13, %v678_v10  ;;  %v686_v4 = vmul.f32 %v1547_v0, %v661_v9  ;;  %v688_v32 = vmul.f32 %v1550_v39, %v658_v41 }
  0xad   :  { %v668_v27 = vsub.f32 %v666_v14, %v667_v58  ;;  %v685_v19 = vadd.f32 %v684_v33, %v683_v48 }
  0xae   :  { %v675_v24 = vadd.f32 %v674_v46, %v673_v2  ;;  %v682_v50 = vsub.f32 %v680_v29, %v681_v45 }
  0xaf   :  { %v687_v21 = vadd.f32 %v686_v4, %v685_v19  ;;  %v690_v5 = vmul.f32 %v668_v27, %v1105_v22  ;;  %v694_v7 = vmul.f32 %v668_v27, %v1178_v53 }
  0xb0   :  { %v691_v34 = vmul.f32 %v675_v24, %v1178_v53  ;;  %v693_v6 = vmul.f32 %v675_v24, %v1105_v22  ;;  %v696_v18 = vmul.f32 %v682_v50, %v1105_v22  ;;  %v700_v59 = vmul.f32 %v682_v50, %v1178_v53 }
  0xb1   :  { %v689_v57 = vadd.f32 %v688_v32, %v687_v21 }
  0xb2   :  { %v692_v26 = vadd.f32 %v691_v34, %v690_v5  ;;  %v695_v28 = vsub.f32 %v693_v6, %v694_v7 }
  0xb3   :  { %v697_v52 = vmul.f32 %v689_v57, %v1178_v53  ;;  %v699_v56 = vmul.f32 %v689_v57, %v1105_v22 }
  0xb4   :  { %v702_v8 = vmul.f32 %v1532_v3, %v692_v26  ;;  %v703_v51 = vmul.f32 %v1562_v62, %v695_v28  ;;  %v709_v30 = vmul.f32 %v1532_v3, %v695_v28  ;;  %v710_v38 = vmul.f32 %v1562_v62, %v692_v26 }
  0xb5   :  { %v698_v42 = vsub.f32 %v696_v18, %v697_v52  ;;  %v701_v47 = vadd.f32 %v700_v59, %v699_v56  ;;  %v716_v41 = vmul.f32 %v1567_v35, %v692_v26  ;;  %v717_v9 = vmul.f32 %v1570_v55, %v695_v28 }
  0xb6   :  { %v704_v16 = vsub.f32 %v702_v8, %v703_v51  ;;  %v711_v54 = vadd.f32 %v710_v38, %v709_v30  ;;  %v723_v53 = vmul.f32 %v1567_v35, %v695_v28  ;;  %v724_v22 = vmul.f32 %v1570_v55, %v692_v26 }
  0xb7   :  { %v705_v17 = vmul.f32 %v1537_v25, %v698_v42  ;;  %v707_v31 = vmul.f32 %v1542_v20, %v701_v47  ;;  %v712_v36 = vmul.f32 %v1537_v25, %v701_v47  ;;  %v714_v15 = vmul.f32 %v1542_v20, %v698_v42 }
  0xb8   :  { %v718_v49 = vsub.f32 %v716_v41, %v717_v9  ;;  %v719_v60 = vmul.f32 %v1547_v0, %v698_v42  ;;  %v721_v58 = vmul.f32 %v1550_v39, %v701_v47  ;;  %v725_v44 = vadd.f32 %v724_v22, %v723_v53 }
  0xb9   :  { %v706_v1 = vadd.f32 %v705_v17, %v704_v16  ;;  %v713_v46 = vadd.f32 %v712_v36, %v711_v54  ;;  %v726_v10 = vmul.f32 %v1547_v0, %v701_v47  ;;  %v728_v13 = vmul.f32 %v1550_v39, %v698_v42 }
  0xba   :  { %v720_v14 = vadd.f32 %v719_v60, %v718_v49 }
  0xbb   :  { %v708_v45 = vsub.f32 %v706_v1, %v707_v31  ;;  %v715_v48 = vadd.f32 %v714_v15, %v713_v46  ;;  %v727_v33 = vadd.f32 %v726_v10, %v725_v44 }
  0xbc   :  { %v722_v2 = vsub.f32 %v720_v14, %v721_v58 }
  0xbd   :  { %v729_v29 = vadd.f32 %v728_v13, %v727_v33  ;;  %v730_v4 = vmul.f32 %v708_v45, %v1709_v61  ;;  %v731_v27 = vmul.f32 %v715_v48, %v1710_v63  ;;  %v733_v19 = vmul.f32 %v715_v48, %v1709_v61 }
  0xbe   :  { %v734_v32 = vmul.f32 %v708_v45, %v1710_v63  ;;  %v736_v24 = vmul.f32 %v722_v2, %v1709_v61  ;;  %v740_v50 = vmul.f32 %v722_v2, %v1710_v63 }
  0xbf   :  { %v732_v21 = vadd.f32 %v731_v27, %v730_v4  ;;  %v737_v5 = vmul.f32 %v729_v29, %v1710_v63  ;;  %v739_v7 = vmul.f32 %v729_v29, %v1709_v61 }
  0xc0   :  { %v735_v34 = vsub.f32 %v733_v19, %v734_v32 }
  0xc1   :  { %v738_v6 = vsub.f32 %v736_v24, %v737_v5  ;;  %v741_v57 = vadd.f32 %v740_v50, %v739_v7  ;;  %v742_v18 = vmul.f32 %v1532_v3, %v732_v21  ;;  %v750_v59 = vmul.f32 %v1562_v62, %v732_v21 }
  0xc2   :  { %v743_v26 = vmul.f32 %v1562_v62, %v735_v34  ;;  %v749_v28 = vmul.f32 %v1532_v3, %v735_v34  ;;  %v756_v52 = vmul.f32 %v1567_v35, %v732_v21  ;;  %v757_v56 = vmul.f32 %v1570_v55, %v735_v34 }
  0xc3   :  { %v745_v8 = vmul.f32 %v1537_v25, %v738_v6  ;;  %v747_v63 = vmul.f32 %v1542_v20, %v741_v57  ;;  %v752_v61 = vmul.f32 %v1537_v25, %v741_v57  ;;  %v754_v51 = vmul.f32 %v1542_v20, %v738_v6 }
  0xc4   :  { %v744_v30 = vsub.f32 %v742_v18, %v743_v26  ;;  %v751_v38 = vadd.f32 %v750_v59, %v749_v28  ;;  %v758_v42 = vsub.f32 %v756_v52, %v757_v56  ;;  %v759_v47 = vmul.f32 %v1547_v0, %v738_v6 }
  0xc5   :  { %v761_v41 = vmul.f32 %v1550_v39, %v741_v57  ;;  %v763_v9 = vmul.f32 %v1567_v35, %v735_v34  ;;  %v764_v16 = vmul.f32 %v1570_v55, %v732_v21  ;;  %v766_v54 = vmul.f32 %v1547_v0, %v741_v57 }
  0xc6   :  { %v746_v53 = vadd.f32 %v745_v8, %v744_v30  ;;  %v753_v22 = vadd.f32 %v752_v61, %v751_v38  ;;  %v760_v17 = vadd.f32 %v759_v47, %v758_v42  ;;  %v768_v36 = vmul.f32 %v1550_v39, %v738_v6 }
  0xc7   :  { %v765_v31 = vadd.f32 %v764_v16, %v763_v9 }
  0xc8   :  { %v748_v15 = vsub.f32 %v746_v53, %v747_v63  ;;  %v755_v49 = vadd.f32 %v754_v51, %v753_v22  ;;  %v762_v60 = vsub.f32 %v760_v17, %v761_v41 }
  0xc9   :  { %v767_v58 = vadd.f32 %v766_v54, %v765_v31 }
  0xca   :  { %v770_v44 = vmul.f32 %v748_v15, %v1711_v23  ;;  %v771_v1 = vmul.f32 %v755_v49, %v1712_v12  ;;  %v773_v46 = vmul.f32 %v755_v49, %v1711_v23  ;;  %v774_v10 = vmul.f32 %v748_v15, %v1712_v12 }
  0xcb   :  { %v769_v13 = vadd.f32 %v768_v36, %v767_v58  ;;  %v776_v14 = vmul.f32 %v762_v60, %v1711_v23  ;;  %v780_v45 = vmul.f32 %v762_v60, %v1712_v12 }
  0xcc   :  { %v772_v48 = vadd.f32 %v771_v1, %v770_v44  ;;  %v775_v33 = vsub.f32 %v773_v46, %v774_v10 }
  0xcd   :  { %v777_v2 = vmul.f32 %v769_v13, %v1712_v12  ;;  %v779_v29 = vmul.f32 %v769_v13, %v1711_v23 }
  0xce   :  { %v782_v4 = vmul.f32 %v1532_v3, %v772_v48  ;;  %v783_v27 = vmul.f32 %v1562_v62, %v775_v33  ;;  %v789_v19 = vmul.f32 %v1532_v3, %v775_v33  ;;  %v790_v32 = vmul.f32 %v1562_v62, %v772_v48 }
  0xcf   :  { %v778_v24 = vsub.f32 %v776_v14, %v777_v2  ;;  %v781_v50 = vadd.f32 %v780_v45, %v779_v29  ;;  %v796_v21 = vmul.f32 %v1567_v35, %v772_v48  ;;  %v797_v5 = vmul.f32 %v1570_v55, %v775_v33 }
  0xd0   :  { %v784_v7 = vsub.f32 %v782_v4, %v783_v27  ;;  %v791_v34 = vadd.f32 %v790_v32, %v789_v19  ;;  %v803_v12 = vmul.f32 %v1567_v35, %v775_v33  ;;  %v804_v23 = vmul.f32 %v1570_v55, %v772_v48 }
  0xd1   :  { %v785_v6 = vmul.f32 %v1537_v25, %v778_v24  ;;  %v787_v57 = vmul.f32 %v1542_v20, %v781_v50  ;;  %v792_v18 = vmul.f32 %v1537_v25, %v781_v50  ;;  %v794_v59 = vmul.f32 %v1542_v20, %v778_v24 }
  0xd2   :  { %v798_v26 = vsub.f32 %v796_v21, %v797_v5  ;;  %v799_v28 = vmul.f32 %v1547_v0, %v778_v24  ;;  %v801_v52 = vmul.f32 %v1550_v39, %v781_v50  ;;  %v805_v56 = vadd.f32 %v804_v23, %v803_v12 }
  0xd3   :  { %v786_v8 = vadd.f32 %v785_v6, %v784_v7  ;;  %v793_v63 = vadd.f32 %v792_v18, %v791_v34  ;;  %v806_v61 = vmul.f32 %v1547_v0, %v781_v50  ;;  %v808_v51 = vmul.f32 %v1550_v39, %v778_v24 }
  0xd4   :  { %v800_v30 = vadd.f32 %v799_v28, %v798_v26 }
  0xd5   :  { %v788_v38 = vsub.f32 %v786_v8, %v787_v57  ;;  %v795_v42 = vadd.f32 %v794_v59, %v793_v63  ;;  %v807_v47 = vadd.f32 %v806_v61, %v805_v56 }
  0xd6   :  { %v802_v41 = vsub.f32 %v800_v30, %v801_v52 }
  0xd7   :  { %v809_v9 = vadd.f32 %v808_v51, %v807_v47  ;;  %v810_v16 = vmul.f32 %v788_v38, %v1713_v40  ;;  %v811_v54 = vmul.f32 %v795_v42, %v1714_v43  ;;  %v813_v53 = vmul.f32 %v795_v42, %v1713_v40 }
  0xd8   :  { %v814_v22 = vmul.f32 %v788_v38, %v1714_v43  ;;  %v816_v17 = vmul.f32 %v802_v41, %v1713_v40  ;;  %v820_v31 = vmul.f32 %v802_v41, %v1714_v43 }
  0xd9   :  { %v812_v36 = vadd.f32 %v811_v54, %v810_v16  ;;  %v817_v15 = vmul.f32 %v809_v9, %v1714_v43  ;;  %v819_v49 = vmul.f32 %v809_v9, %v1713_v40 }
  0xda   :  { %v815_v60 = vsub.f32 %v813_v53, %v814_v22 }
  0xdb   :  { %v818_v58 = vsub.f32 %v816_v17, %v817_v15  ;;  %v821_v44 = vadd.f32 %v820_v31, %v819_v49  ;;  %v822_v1 = vmul.f32 %v1532_v3, %v812_v36  ;;  %v830_v46 = vmul.f32 %v1562_v62, %v812_v36 }
  0xdc   :  { %v823_v10 = vmul.f32 %v1562_v62, %v815_v60  ;;  %v829_v13 = vmul.f32 %v1532_v3, %v815_v60  ;;  %v836_v14 = vmul.f32 %v1567_v35, %v812_v36  ;;  %v837_v45 = vmul.f32 %v1570_v55, %v815_v60 }
  0xdd   :  { %v825_v48 = vmul.f32 %v1537_v25, %v818_v58  ;;  %v827_v43 = vmul.f32 %v1542_v20, %v821_v44  ;;  %v832_v40 = vmul.f32 %v1537_v25, %v821_v44  ;;  %v834_v33 = vmul.f32 %v1542_v20, %v818_v58 }
  0xde   :  { %v824_v2 = vsub.f32 %v822_v1, %v823_v10  ;;  %v831_v29 = vadd.f32 %v830_v46, %v829_v13  ;;  %v838_v4 = vsub.f32 %v836_v14, %v837_v45  ;;  %v839_v27 = vmul.f32 %v1547_v0, %v818_v58 }
  0xdf   :  { %v841_v62 = vmul.f32 %v1550_v39, %v821_v44  ;;  %v843_v3 = vmul.f32 %v1567_v35, %v815_v60  ;;  %v844_v19 = vmul.f32 %v1570_v55, %v812_v36  ;;  %v846_v32 = vmul.f32 %v1547_v0, %v821_v44 }
  0xe0   :  { %v826_v24 = vadd.f32 %v825_v48, %v824_v2  ;;  %v833_v50 = vadd.f32 %v832_v40, %v831_v29  ;;  %v840_v21 = vadd.f32 %v839_v27, %v838_v4  ;;  %v848_v25 = vmul.f32 %v1550_v39, %v818_v58 }
  0xe1   :  { %v845_v5 = vadd.f32 %v844_v19, %v843_v3 }
  0xe2   :  { %v828_v20 = vsub.f32 %v826_v24, %v827_v43  ;;  %v835_v7 = vadd.f32 %v834_v33, %v833_v50  ;;  %v842_v34 = vsub.f32 %v840_v21, %v841_v62 }
  0xe3   :  { %v847_v12 = vadd.f32 %v846_v32, %v845_v5 }
  0xe4   :  { %v850_v23 = vmul.f32 %v828_v20, %v1715_v37  ;;  %v851_v6 = vmul.f32 %v835_v7, %v1716_v11  ;;  %v853_v35 = vmul.f32 %v842_v34, %v1715_v37 }
  0xe5   :  { %v849_v57 = vadd.f32 %v848_v25, %v847_v12 }
  0xe6   :  { %v852_v55 = vadd.f32 %v851_v6, %v850_v23 }
  0xe7   :  { %v854_v0 = vmul.f32 %v849_v57, %v1716_v11 }
  0xe9   :  { %v855_v39 = vsub.f32 %v853_v35, %v854_v0 }
  0xeb   :  { %v856_v18 = vadd.f32 %v855_v39, %v852_v55 }
  0xed   :  { %858 = vst [vmem:[#allocation9 + $0x8] sm:$0xff] %v856_v18 }
  0xee   :  { %871 = dma.vmem_to_hbm [thread:$0]  %s864_s21, 256, %s866_s24, [#allocation4], %s1011_s25, %s1011_s25, %s1012_s0  }
  0xef   :  { %1006 = dma.done.wait [#allocation4], 256  }
  0xf0   :  { %1007 = vsyncadd [#allocation4], 4294967040 }
  0xf1   :  { %876 = vsyncpa [#allocation3], 1 }
  0xf2   :  { %877 = vsyncpa [#allocation4], 1 }
  0xf3   :  { %878 = vsyncpa [#allocation5], 1 }
  0xf4   :  { %879 = vsyncpa [#allocation7], 1 }

</bundles_post_ra>
